<compile_context>
chip_gen: v6e
topology: v6e:2x2x1
jax: 0.10.0
libtpu: 0.0.40
codegen_flags: <defaults>
</compile_context>

<pallas_src>
import functools

import jax
import jax.numpy as jnp
from jax.experimental import pallas as pl
from jax.experimental.pallas import tpu as pltpu


# ---------------------------------------------------------------------------
# Kernel: LSTM layer 0 + LSTM layer 1 (skew-fused) -> FC -> softmax(dim=1).
# Gate order matches PyTorch nn.LSTM: i, f, g, o.
# ---------------------------------------------------------------------------
def fused_lstm_kernel(x_ref, wih0_ref, wrec_ref, b0_ref, b1_ref,
                      wfc_ref, bfc_ref, out_ref, *, T, H):
    """Fused 2-layer LSTM + FC + softmax for one batch block.

    x_ref : (B*T, D)  batch-major rows (row b*T + t == x[b, t, :]), f32
    wih0  : (D, 4H)   layer-0 input weights           (matmul dtype)
    wrec  : (2H, 8H)  [[W_hh0, W_ih1], [0, W_hh1]]    (matmul dtype)
    b0/b1 : (1, 4H)   combined b_ih + b_hh per layer, f32
    wfc   : (T*H, C)  FC weights (matmul dtype), bfc: (1, C) f32
    out   : (B, C)    softmax probabilities, f32
    """
    B = out_ref.shape[0]
    G = 4 * H
    mm_dtype = wih0_ref.dtype

    def lstm_cell(gates, c_prev):
        # TODO(synk): at larger H, avoid the four sub-128-lane gate slices via
        # full-width sigmoid/tanh + lane masks + pltpu.roll (or a per-gate
        # (4B, H) layout); only ~5% at H=32, so kept simple here.
        i_g = jax.nn.sigmoid(gates[:, 0:H])
        f_g = jax.nn.sigmoid(gates[:, H:2 * H])
        g_g = jnp.tanh(gates[:, 2 * H:3 * H])
        o_g = jax.nn.sigmoid(gates[:, 3 * H:4 * H])
        c_new = f_g * c_prev + i_g * g_g
        h_new = o_g * jnp.tanh(c_new)
        return h_new, c_new

    # Hoisted input projection for ALL timesteps: one matmul, off the serial
    # recurrence path.  Bias b0 is folded in here (f32 accumulation).
    gx0 = jnp.dot(x_ref[...].astype(mm_dtype), wih0_ref[...],
                  preferred_element_type=jnp.float32) + b0_ref[...]    # (B*T, 4H)
    # TODO(synk): if T*B*4H grows to many vregs, stash gx0 in a VMEM scratch
    # and slice per step instead of keeping it live across the unrolled loop.
    gx0 = gx0.reshape(B, T, G)                   # [b, t, :] == row b*T + t

    wrec = wrec_ref[...]                         # (2H, 8H)
    b1 = jnp.broadcast_to(b1_ref[...], (B, G))   # hoisted broadcast (f32)

    # ---- super-step 0: layer-0 timestep 0 only (h0_{-1}=0 => no matmul) ----
    h0, c0 = lstm_cell(gx0[:, 0, :], jnp.zeros((B, H), jnp.float32))
    h1 = jnp.zeros((B, H), jnp.float32)
    c1 = jnp.zeros((B, H), jnp.float32)
    outs = []

    # ---- super-steps 1..T-1: layer-0 step s fused with layer-1 step s-1 ----
    # T is small -> static unroll; the LLO scheduler sees the whole chain.
    for s in range(1, T):
        lhs = jnp.concatenate([h0, h1], axis=1).astype(mm_dtype)        # (B, 2H)
        rec = jnp.dot(lhs, wrec, preferred_element_type=jnp.float32)    # (B, 8H)
        gates = jnp.concatenate(
            [rec[:, :G] + gx0[:, s, :],   # layer-0 gates at t = s
             rec[:, G:] + b1],            # layer-1 gates at t = s-1
            axis=0)                                                      # (2B, 4H)
        h_cat, c_cat = lstm_cell(gates, jnp.concatenate([c0, c1], axis=0))
        h0, h1 = h_cat[:B], h_cat[B:]
        c0, c1 = c_cat[:B], c_cat[B:]
        outs.append(h1)                   # h1 after layer-1 timestep s-1

    # ---- super-step T: layer-1 timestep T-1 only ----
    lhs = jnp.concatenate([h0, h1], axis=1).astype(mm_dtype)
    rec = jnp.dot(lhs, wrec, preferred_element_type=jnp.float32)
    h1, c1 = lstm_cell(rec[:, G:] + b1, c1)
    outs.append(h1)

    # ---- FC + softmax(dim=1); feature index t*H + h == torch reshape order ----
    fc_in = jnp.concatenate(outs, axis=1)                                # (B, T*H)
    logits = jnp.dot(fc_in.astype(mm_dtype), wfc_ref[...],
                     preferred_element_type=jnp.float32) + bfc_ref[...]  # (B, C)
    m = jnp.max(logits, axis=1, keepdims=True)
    e = jnp.exp(logits - m)
    out_ref[...] = (e / jnp.sum(e, axis=1, keepdims=True)).astype(out_ref.dtype)


# ---------------------------------------------------------------------------
# Wrapper: single pallas_call; optional batch-block grid for v7x's 2 cores.
# ---------------------------------------------------------------------------
def lstm_model_forward(x, params, *, matmul_dtype=jnp.bfloat16, num_batch_blocks=1):
    """x: (B, T, D_in) batch-first, like the PyTorch module. Returns (B, C) probs.

    matmul_dtype: dtype of MXU operands only; element-wise / gate / state math
        stays f32 regardless (keep it that way — v5e has no bf16 VPU/EUP).
    num_batch_blocks: grid size over batch blocks; keep 1 on v5e/v6e (1 TC),
        set 2 on v7x (2 TCs) once B//2 is a multiple of 8.
    """
    B, T, D = x.shape
    H = params["w_hh_l0_t"].shape[0]
    C = params["w_fc_t"].shape[1]
    G = 4 * H

    assert B % num_batch_blocks == 0
    Bb = B // num_batch_blocks
    if num_batch_blocks > 1:
        assert Bb % 8 == 0, "per-core batch block must be a multiple of 8 sublanes"

    # Free metadata-only reshape (no transpose, no extra HBM round trip):
    # row b*T + t of x_bt is x[b, t, :].  dtype casts happen in-kernel.
    x_bt = x.reshape(B * T, D)

    wih0 = params["w_ih_l0_t"].astype(matmul_dtype)
    wrec = params["w_rec_t"].astype(matmul_dtype)
    wfc = params["w_fc_t"].astype(matmul_dtype)

    kernel = functools.partial(fused_lstm_kernel, T=T, H=H)

    # VMEM footprint is <1 MiB at these shapes on all generations; re-derive
    # (and set vmem_limit_bytes) before scaling T/B/H, esp. for v7x's 64 MiB.
    return pl.pallas_call(
        kernel,
        grid=(num_batch_blocks,),
        out_shape=jax.ShapeDtypeStruct((B, C), jnp.float32),
        in_specs=[
            pl.BlockSpec((Bb * T, D), lambda i: (i, 0)),     # x (batch-major rows)
            pl.BlockSpec((D, G), lambda i: (0, 0)),          # W_ih layer 0
            pl.BlockSpec((2 * H, 2 * G), lambda i: (0, 0)),  # fused recurrent RHS
            pl.BlockSpec((1, G), lambda i: (0, 0)),          # bias layer 0
            pl.BlockSpec((1, G), lambda i: (0, 0)),          # bias layer 1
            pl.BlockSpec((T * H, C), lambda i: (0, 0)),      # W_fc
            pl.BlockSpec((1, C), lambda i: (0, 0)),          # b_fc
        ],
        out_specs=pl.BlockSpec((Bb, C), lambda i: (i, 0)),
        compiler_params=pltpu.CompilerParams(
            dimension_semantics=("parallel",)),
    )(x_bt, wih0, wrec, params["b_l0"], params["b_l1"], wfc, params["b_fc"])


# ---------------------------------------------------------------------------
# Deterministic parameter init (PyTorch-style uniform(-1/sqrt(H), 1/sqrt(H)))
# ---------------------------------------------------------------------------
def init_params(key, in_features, hidden_dim, seq_len, classes_num):
    H = hidden_dim
    keys = jax.random.split(key, 12)
    s_lstm = 1.0 / jnp.sqrt(H)

    def u(k, shape, scale):
        return jax.random.uniform(k, shape, jnp.float32, -scale, scale)

    # layer 0
    w_ih_l0 = u(keys[0], (4 * H, in_features), s_lstm)
    w_hh_l0 = u(keys[1], (4 * H, H), s_lstm)
    b_ih_l0 = u(keys[2], (4 * H,), s_lstm)
    b_hh_l0 = u(keys[3], (4 * H,), s_lstm)
    # layer 1
    w_ih_l1 = u(keys[4], (4 * H, H), s_lstm)
    w_hh_l1 = u(keys[5], (4 * H, H), s_lstm)
    b_ih_l1 = u(keys[6], (4 * H,), s_lstm)
    b_hh_l1 = u(keys[7], (4 * H,), s_lstm)
    # fc
    fan_in = H * seq_len
    s_fc = 1.0 / jnp.sqrt(fan_in)
    w_fc = u(keys[8], (classes_num, fan_in), s_fc)
    b_fc = u(keys[9], (classes_num,), s_fc)

    # Fused recurrent RHS: [h0_prev | h1_prev] @ w_rec_t gives
    #   cols[:4H] = h0_prev @ W_hh0                      (layer-0 recurrent term)
    #   cols[4H:] = h0_prev @ W_ih1 + h1_prev @ W_hh1    (layer-1 gates term)
    w_rec_t = jnp.concatenate([
        jnp.concatenate([w_hh_l0.T, w_ih_l1.T], axis=1),
        jnp.concatenate([jnp.zeros((H, 4 * H), jnp.float32), w_hh_l1.T], axis=1),
    ], axis=0)                                             # (2H, 8H)

    return {
        "w_ih_l0_t": w_ih_l0.T,                            # (D_in, 4H)
        "w_hh_l0_t": w_hh_l0.T,                            # (H, 4H)
        "b_l0": (b_ih_l0 + b_hh_l0).reshape(1, -1),        # (1, 4H)
        "w_ih_l1_t": w_ih_l1.T,                            # (H, 4H)
        "w_hh_l1_t": w_hh_l1.T,                            # (H, 4H)
        "b_l1": (b_ih_l1 + b_hh_l1).reshape(1, -1),        # (1, 4H)
        "w_rec_t": w_rec_t,                                # (2H, 8H)
        "w_fc_t": w_fc.T,                                  # (T*H, C)
        "b_fc": b_fc.reshape(1, -1),                       # (1, C)
    }


# ---------------------------------------------------------------------------
# Pure-JAX reference (for correctness check, f32 / high precision)
# ---------------------------------------------------------------------------
def reference_forward(x, params):
    B, T, D = x.shape
    H = params["w_hh_l0_t"].shape[0]
    hp = jax.lax.Precision.HIGHEST

    def run_layer(inp, wih_t, whh_t, b):
        def step(carry, x_t):
            h, c = carry
            g = (jnp.dot(x_t, wih_t, precision=hp)
                 + jnp.dot(h, whh_t, precision=hp) + b[0])
            i = jax.nn.sigmoid(g[:, :H])
            f = jax.nn.sigmoid(g[:, H:2 * H])
            gg = jnp.tanh(g[:, 2 * H:3 * H])
            o = jax.nn.sigmoid(g[:, 3 * H:4 * H])
            c = f * c + i * gg
            h = o * jnp.tanh(c)
            return (h, c), h

        x_t_major = jnp.transpose(inp, (1, 0, 2))
        init = (jnp.zeros((B, H), jnp.float32), jnp.zeros((B, H), jnp.float32))
        _, hs = jax.lax.scan(step, init, x_t_major)
        return jnp.transpose(hs, (1, 0, 2))                 # (B, T, H)

    h1 = run_layer(x, params["w_ih_l0_t"], params["w_hh_l0_t"], params["b_l0"])
    h2 = run_layer(h1, params["w_ih_l1_t"], params["w_hh_l1_t"], params["b_l1"])
    flat = h2.reshape(B, -1)
    logits = jnp.dot(flat, params["w_fc_t"], precision=hp) + params["b_fc"][0]
    return jax.nn.softmax(logits, axis=1)


if __name__ == "__main__":
    # Small shapes: batch=8 (fills f32 sublanes), seq=8, in_features=16,
    # hidden=32, classes=4.
    B, T, D_IN, HID, C = 8, 8, 16, 32, 4

    key = jax.random.PRNGKey(0)
    k_x, k_p = jax.random.split(key)
    x = jax.random.normal(k_x, (B, T, D_IN), dtype=jnp.float32)
    params = init_params(k_p, D_IN, HID, T, C)

    # Default path: bf16 MXU operands, f32 accumulation / gate math.
    fwd_bf16 = jax.jit(functools.partial(lstm_model_forward, params=params))
    # f32-matmul path for a tight numerical check against the reference.
    fwd_f32 = jax.jit(functools.partial(lstm_model_forward, params=params,
                                        matmul_dtype=jnp.float32))

    out = fwd_bf16(x)
    out_f32 = fwd_f32(x)
    jax.block_until_ready((out, out_f32))

    ref = reference_forward(x, params)

    assert out.shape == (B, C)
    # softmax rows should sum to 1 (computed in f32 in-kernel)
    assert jnp.allclose(jnp.sum(out, axis=1), 1.0, atol=1e-5)
    # f32-matmul kernel matches the pure-JAX reference tightly
    assert jnp.allclose(out_f32, ref, rtol=2e-3, atol=2e-3)
    # default bf16-MXU kernel matches within bf16 rounding over T steps
    assert jnp.allclose(out, ref, rtol=3e-2, atol=2e-2)
    print("KERNEL_OK")
</pallas_src>

<mosaic_0001>
module attributes {stable_mosaic.version = 11 : i64} {
  func.func @fused_lstm_kernel(%arg0: i32, %arg1: memref<64x16xf32, #tpu.memory_space<vmem>>, %arg2: memref<16x128xbf16, #tpu.memory_space<vmem>>, %arg3: memref<64x256xbf16, #tpu.memory_space<vmem>>, %arg4: memref<1x128xf32, #tpu.memory_space<vmem>>, %arg5: memref<1x128xf32, #tpu.memory_space<vmem>>, %arg6: memref<256x4xbf16, #tpu.memory_space<vmem>>, %arg7: memref<1x4xf32, #tpu.memory_space<vmem>>, %arg8: memref<8x4xf32, #tpu.memory_space<vmem>>) attributes {dimension_semantics = [#tpu.dimension_semantics<parallel>], iteration_bounds = array<i64: 1>, scalar_prefetch = 0 : i64, scratch_operands = 0 : i64, tpu.core_type = #tpu.core_type<tc>, window_params = [{transform_indices = @transform_0, window_bounds = array<i64: 64, 16>}, {pipeline_mode = #tpu.pipeline_mode<synchronous>, transform_indices = @transform_1, window_bounds = array<i64: 16, 128>}, {pipeline_mode = #tpu.pipeline_mode<synchronous>, transform_indices = @transform_2, window_bounds = array<i64: 64, 256>}, {pipeline_mode = #tpu.pipeline_mode<synchronous>, transform_indices = @transform_3, window_bounds = array<i64: 1, 128>}, {pipeline_mode = #tpu.pipeline_mode<synchronous>, transform_indices = @transform_4, window_bounds = array<i64: 1, 128>}, {pipeline_mode = #tpu.pipeline_mode<synchronous>, transform_indices = @transform_5, window_bounds = array<i64: 256, 4>}, {pipeline_mode = #tpu.pipeline_mode<synchronous>, transform_indices = @transform_6, window_bounds = array<i64: 1, 4>}, {transform_indices = @transform_7, window_bounds = array<i64: 8, 4>}]} {
    %c0 = arith.constant 0 : index
    %c0_0 = arith.constant 0 : index
    %0 = vector.load %arg1[%c0, %c0_0] : memref<64x16xf32, #tpu.memory_space<vmem>>, vector<64x16xf32>
    %1 = arith.truncf %0 : vector<64x16xf32> to vector<64x16xbf16>
    %c0_1 = arith.constant 0 : index
    %c0_2 = arith.constant 0 : index
    %2 = vector.load %arg2[%c0_1, %c0_2] : memref<16x128xbf16, #tpu.memory_space<vmem>>, vector<16x128xbf16>
    %cst = arith.constant dense<0.000000e+00> : vector<64x128xf32>
    %3 = tpu.matmul %1, %2, %cst {dimension_numbers = #tpu.dot_dimension_numbers<[1], [0], [0], [1], [0, 0, 1, 1], [], []>} : vector<64x16xbf16>, vector<16x128xbf16>, vector<64x128xf32> -> vector<64x128xf32>
    %c0_3 = arith.constant 0 : index
    %c0_4 = arith.constant 0 : index
    %4 = vector.load %arg4[%c0_3, %c0_4] : memref<1x128xf32, #tpu.memory_space<vmem>>, vector<1x128xf32>
    %5 = vector.broadcast %4 : vector<1x128xf32> to vector<64x128xf32>
    %6 = arith.addf %3, %5 : vector<64x128xf32>
    %7 = vector.shape_cast %6 : vector<64x128xf32> to vector<8x8x128xf32>
    %c0_5 = arith.constant 0 : index
    %c0_6 = arith.constant 0 : index
    %8 = vector.load %arg3[%c0_5, %c0_6] : memref<64x256xbf16, #tpu.memory_space<vmem>>, vector<64x256xbf16>
    %c0_7 = arith.constant 0 : index
    %c0_8 = arith.constant 0 : index
    %9 = vector.load %arg5[%c0_7, %c0_8] : memref<1x128xf32, #tpu.memory_space<vmem>>, vector<1x128xf32>
    %10 = vector.shape_cast %9 : vector<1x128xf32> to vector<1x128xf32>
    %11 = vector.broadcast %10 : vector<1x128xf32> to vector<8x128xf32>
    %12 = vector.extract_strided_slice %7 {offsets = [0, 0, 0], sizes = [8, 1, 128], strides = [1, 1, 1]} : vector<8x8x128xf32> to vector<8x1x128xf32>
    %13 = vector.shape_cast %12 : vector<8x1x128xf32> to vector<8x128xf32>
    %cst_9 = arith.constant 0.000000e+00 : f32
    %14 = vector.broadcast %cst_9 : f32 to vector<8x32xf32>
    %15 = vector.extract_strided_slice %13 {offsets = [0, 0], sizes = [8, 32], strides = [1, 1]} : vector<8x128xf32> to vector<8x32xf32>
    %16 = arith.negf %15 : vector<8x32xf32>
    %17 = math.exp %16 : vector<8x32xf32>
    %cst_10 = arith.constant 1.000000e+00 : f32
    %18 = vector.broadcast %cst_10 : f32 to vector<8x32xf32>
    %19 = arith.addf %18, %17 : vector<8x32xf32>
    %20 = arith.divf %18, %19 : vector<8x32xf32>
    %21 = vector.extract_strided_slice %13 {offsets = [0, 32], sizes = [8, 32], strides = [1, 1]} : vector<8x128xf32> to vector<8x32xf32>
    %22 = arith.negf %21 : vector<8x32xf32>
    %23 = math.exp %22 : vector<8x32xf32>
    %cst_11 = arith.constant 1.000000e+00 : f32
    %24 = vector.broadcast %cst_11 : f32 to vector<8x32xf32>
    %25 = arith.addf %24, %23 : vector<8x32xf32>
    %26 = arith.divf %24, %25 : vector<8x32xf32>
    %27 = vector.extract_strided_slice %13 {offsets = [0, 64], sizes = [8, 32], strides = [1, 1]} : vector<8x128xf32> to vector<8x32xf32>
    %28 = math.tanh %27 : vector<8x32xf32>
    %29 = vector.extract_strided_slice %13 {offsets = [0, 96], sizes = [8, 32], strides = [1, 1]} : vector<8x128xf32> to vector<8x32xf32>
    %30 = arith.negf %29 : vector<8x32xf32>
    %31 = math.exp %30 : vector<8x32xf32>
    %cst_12 = arith.constant 1.000000e+00 : f32
    %32 = vector.broadcast %cst_12 : f32 to vector<8x32xf32>
    %33 = arith.addf %32, %31 : vector<8x32xf32>
    %34 = arith.divf %32, %33 : vector<8x32xf32>
    %35 = arith.mulf %26, %14 : vector<8x32xf32>
    %36 = arith.mulf %20, %28 : vector<8x32xf32>
    %37 = arith.addf %35, %36 : vector<8x32xf32>
    %38 = math.tanh %37 : vector<8x32xf32>
    %39 = arith.mulf %34, %38 : vector<8x32xf32>
    %cst_13 = arith.constant 0.000000e+00 : f32
    %40 = vector.broadcast %cst_13 : f32 to vector<8x32xf32>
    %cst_14 = arith.constant 0.000000e+00 : f32
    %41 = vector.broadcast %cst_14 : f32 to vector<8x32xf32>
    %42 = tpu.concatenate %39, %40 in 1 : vector<8x32xf32>, vector<8x32xf32> -> vector<8x64xf32>
    %43 = arith.truncf %42 : vector<8x64xf32> to vector<8x64xbf16>
    %cst_15 = arith.constant dense<0.000000e+00> : vector<8x256xf32>
    %44 = tpu.matmul %43, %8, %cst_15 {dimension_numbers = #tpu.dot_dimension_numbers<[1], [0], [0], [1], [0, 0, 1, 1], [], []>} : vector<8x64xbf16>, vector<64x256xbf16>, vector<8x256xf32> -> vector<8x256xf32>
    %45 = vector.extract_strided_slice %44 {offsets = [0, 0], sizes = [8, 128], strides = [1, 1]} : vector<8x256xf32> to vector<8x128xf32>
    %46 = vector.extract_strided_slice %7 {offsets = [0, 1, 0], sizes = [8, 1, 128], strides = [1, 1, 1]} : vector<8x8x128xf32> to vector<8x1x128xf32>
    %47 = vector.shape_cast %46 : vector<8x1x128xf32> to vector<8x128xf32>
    %48 = arith.addf %45, %47 : vector<8x128xf32>
    %49 = vector.extract_strided_slice %44 {offsets = [0, 128], sizes = [8, 128], strides = [1, 1]} : vector<8x256xf32> to vector<8x128xf32>
    %50 = arith.addf %49, %11 : vector<8x128xf32>
    %51 = tpu.concatenate %48, %50 in 0 : vector<8x128xf32>, vector<8x128xf32> -> vector<16x128xf32>
    %52 = tpu.concatenate %37, %41 in 0 : vector<8x32xf32>, vector<8x32xf32> -> vector<16x32xf32>
    %53 = vector.extract_strided_slice %51 {offsets = [0, 0], sizes = [16, 32], strides = [1, 1]} : vector<16x128xf32> to vector<16x32xf32>
    %54 = arith.negf %53 : vector<16x32xf32>
    %55 = math.exp %54 : vector<16x32xf32>
    %cst_16 = arith.constant 1.000000e+00 : f32
    %56 = vector.broadcast %cst_16 : f32 to vector<16x32xf32>
    %57 = arith.addf %56, %55 : vector<16x32xf32>
    %58 = arith.divf %56, %57 : vector<16x32xf32>
    %59 = vector.extract_strided_slice %51 {offsets = [0, 32], sizes = [16, 32], strides = [1, 1]} : vector<16x128xf32> to vector<16x32xf32>
    %60 = arith.negf %59 : vector<16x32xf32>
    %61 = math.exp %60 : vector<16x32xf32>
    %cst_17 = arith.constant 1.000000e+00 : f32
    %62 = vector.broadcast %cst_17 : f32 to vector<16x32xf32>
    %63 = arith.addf %62, %61 : vector<16x32xf32>
    %64 = arith.divf %62, %63 : vector<16x32xf32>
    %65 = vector.extract_strided_slice %51 {offsets = [0, 64], sizes = [16, 32], strides = [1, 1]} : vector<16x128xf32> to vector<16x32xf32>
    %66 = math.tanh %65 : vector<16x32xf32>
    %67 = vector.extract_strided_slice %51 {offsets = [0, 96], sizes = [16, 32], strides = [1, 1]} : vector<16x128xf32> to vector<16x32xf32>
    %68 = arith.negf %67 : vector<16x32xf32>
    %69 = math.exp %68 : vector<16x32xf32>
    %cst_18 = arith.constant 1.000000e+00 : f32
    %70 = vector.broadcast %cst_18 : f32 to vector<16x32xf32>
    %71 = arith.addf %70, %69 : vector<16x32xf32>
    %72 = arith.divf %70, %71 : vector<16x32xf32>
    %73 = arith.mulf %64, %52 : vector<16x32xf32>
    %74 = arith.mulf %58, %66 : vector<16x32xf32>
    %75 = arith.addf %73, %74 : vector<16x32xf32>
    %76 = math.tanh %75 : vector<16x32xf32>
    %77 = arith.mulf %72, %76 : vector<16x32xf32>
    %78 = vector.extract_strided_slice %77 {offsets = [0, 0], sizes = [8, 32], strides = [1, 1]} : vector<16x32xf32> to vector<8x32xf32>
    %79 = vector.extract_strided_slice %77 {offsets = [8, 0], sizes = [8, 32], strides = [1, 1]} : vector<16x32xf32> to vector<8x32xf32>
    %80 = vector.extract_strided_slice %75 {offsets = [0, 0], sizes = [8, 32], strides = [1, 1]} : vector<16x32xf32> to vector<8x32xf32>
    %81 = vector.extract_strided_slice %75 {offsets = [8, 0], sizes = [8, 32], strides = [1, 1]} : vector<16x32xf32> to vector<8x32xf32>
    %82 = tpu.concatenate %78, %79 in 1 : vector<8x32xf32>, vector<8x32xf32> -> vector<8x64xf32>
    %83 = arith.truncf %82 : vector<8x64xf32> to vector<8x64xbf16>
    %cst_19 = arith.constant dense<0.000000e+00> : vector<8x256xf32>
    %84 = tpu.matmul %83, %8, %cst_19 {dimension_numbers = #tpu.dot_dimension_numbers<[1], [0], [0], [1], [0, 0, 1, 1], [], []>} : vector<8x64xbf16>, vector<64x256xbf16>, vector<8x256xf32> -> vector<8x256xf32>
    %85 = vector.extract_strided_slice %84 {offsets = [0, 0], sizes = [8, 128], strides = [1, 1]} : vector<8x256xf32> to vector<8x128xf32>
    %86 = vector.extract_strided_slice %7 {offsets = [0, 2, 0], sizes = [8, 1, 128], strides = [1, 1, 1]} : vector<8x8x128xf32> to vector<8x1x128xf32>
    %87 = vector.shape_cast %86 : vector<8x1x128xf32> to vector<8x128xf32>
    %88 = arith.addf %85, %87 : vector<8x128xf32>
    %89 = vector.extract_strided_slice %84 {offsets = [0, 128], sizes = [8, 128], strides = [1, 1]} : vector<8x256xf32> to vector<8x128xf32>
    %90 = arith.addf %89, %11 : vector<8x128xf32>
    %91 = tpu.concatenate %88, %90 in 0 : vector<8x128xf32>, vector<8x128xf32> -> vector<16x128xf32>
    %92 = tpu.concatenate %80, %81 in 0 : vector<8x32xf32>, vector<8x32xf32> -> vector<16x32xf32>
    %93 = vector.extract_strided_slice %91 {offsets = [0, 0], sizes = [16, 32], strides = [1, 1]} : vector<16x128xf32> to vector<16x32xf32>
    %94 = arith.negf %93 : vector<16x32xf32>
    %95 = math.exp %94 : vector<16x32xf32>
    %cst_20 = arith.constant 1.000000e+00 : f32
    %96 = vector.broadcast %cst_20 : f32 to vector<16x32xf32>
    %97 = arith.addf %96, %95 : vector<16x32xf32>
    %98 = arith.divf %96, %97 : vector<16x32xf32>
    %99 = vector.extract_strided_slice %91 {offsets = [0, 32], sizes = [16, 32], strides = [1, 1]} : vector<16x128xf32> to vector<16x32xf32>
    %100 = arith.negf %99 : vector<16x32xf32>
    %101 = math.exp %100 : vector<16x32xf32>
    %cst_21 = arith.constant 1.000000e+00 : f32
    %102 = vector.broadcast %cst_21 : f32 to vector<16x32xf32>
    %103 = arith.addf %102, %101 : vector<16x32xf32>
    %104 = arith.divf %102, %103 : vector<16x32xf32>
    %105 = vector.extract_strided_slice %91 {offsets = [0, 64], sizes = [16, 32], strides = [1, 1]} : vector<16x128xf32> to vector<16x32xf32>
    %106 = math.tanh %105 : vector<16x32xf32>
    %107 = vector.extract_strided_slice %91 {offsets = [0, 96], sizes = [16, 32], strides = [1, 1]} : vector<16x128xf32> to vector<16x32xf32>
    %108 = arith.negf %107 : vector<16x32xf32>
    %109 = math.exp %108 : vector<16x32xf32>
    %cst_22 = arith.constant 1.000000e+00 : f32
    %110 = vector.broadcast %cst_22 : f32 to vector<16x32xf32>
    %111 = arith.addf %110, %109 : vector<16x32xf32>
    %112 = arith.divf %110, %111 : vector<16x32xf32>
    %113 = arith.mulf %104, %92 : vector<16x32xf32>
    %114 = arith.mulf %98, %106 : vector<16x32xf32>
    %115 = arith.addf %113, %114 : vector<16x32xf32>
    %116 = math.tanh %115 : vector<16x32xf32>
    %117 = arith.mulf %112, %116 : vector<16x32xf32>
    %118 = vector.extract_strided_slice %117 {offsets = [0, 0], sizes = [8, 32], strides = [1, 1]} : vector<16x32xf32> to vector<8x32xf32>
    %119 = vector.extract_strided_slice %117 {offsets = [8, 0], sizes = [8, 32], strides = [1, 1]} : vector<16x32xf32> to vector<8x32xf32>
    %120 = vector.extract_strided_slice %115 {offsets = [0, 0], sizes = [8, 32], strides = [1, 1]} : vector<16x32xf32> to vector<8x32xf32>
    %121 = vector.extract_strided_slice %115 {offsets = [8, 0], sizes = [8, 32], strides = [1, 1]} : vector<16x32xf32> to vector<8x32xf32>
    %122 = tpu.concatenate %118, %119 in 1 : vector<8x32xf32>, vector<8x32xf32> -> vector<8x64xf32>
    %123 = arith.truncf %122 : vector<8x64xf32> to vector<8x64xbf16>
    %cst_23 = arith.constant dense<0.000000e+00> : vector<8x256xf32>
    %124 = tpu.matmul %123, %8, %cst_23 {dimension_numbers = #tpu.dot_dimension_numbers<[1], [0], [0], [1], [0, 0, 1, 1], [], []>} : vector<8x64xbf16>, vector<64x256xbf16>, vector<8x256xf32> -> vector<8x256xf32>
    %125 = vector.extract_strided_slice %124 {offsets = [0, 0], sizes = [8, 128], strides = [1, 1]} : vector<8x256xf32> to vector<8x128xf32>
    %126 = vector.extract_strided_slice %7 {offsets = [0, 3, 0], sizes = [8, 1, 128], strides = [1, 1, 1]} : vector<8x8x128xf32> to vector<8x1x128xf32>
    %127 = vector.shape_cast %126 : vector<8x1x128xf32> to vector<8x128xf32>
    %128 = arith.addf %125, %127 : vector<8x128xf32>
    %129 = vector.extract_strided_slice %124 {offsets = [0, 128], sizes = [8, 128], strides = [1, 1]} : vector<8x256xf32> to vector<8x128xf32>
    %130 = arith.addf %129, %11 : vector<8x128xf32>
    %131 = tpu.concatenate %128, %130 in 0 : vector<8x128xf32>, vector<8x128xf32> -> vector<16x128xf32>
    %132 = tpu.concatenate %120, %121 in 0 : vector<8x32xf32>, vector<8x32xf32> -> vector<16x32xf32>
    %133 = vector.extract_strided_slice %131 {offsets = [0, 0], sizes = [16, 32], strides = [1, 1]} : vector<16x128xf32> to vector<16x32xf32>
    %134 = arith.negf %133 : vector<16x32xf32>
    %135 = math.exp %134 : vector<16x32xf32>
    %cst_24 = arith.constant 1.000000e+00 : f32
    %136 = vector.broadcast %cst_24 : f32 to vector<16x32xf32>
    %137 = arith.addf %136, %135 : vector<16x32xf32>
    %138 = arith.divf %136, %137 : vector<16x32xf32>
    %139 = vector.extract_strided_slice %131 {offsets = [0, 32], sizes = [16, 32], strides = [1, 1]} : vector<16x128xf32> to vector<16x32xf32>
    %140 = arith.negf %139 : vector<16x32xf32>
    %141 = math.exp %140 : vector<16x32xf32>
    %cst_25 = arith.constant 1.000000e+00 : f32
    %142 = vector.broadcast %cst_25 : f32 to vector<16x32xf32>
    %143 = arith.addf %142, %141 : vector<16x32xf32>
    %144 = arith.divf %142, %143 : vector<16x32xf32>
    %145 = vector.extract_strided_slice %131 {offsets = [0, 64], sizes = [16, 32], strides = [1, 1]} : vector<16x128xf32> to vector<16x32xf32>
    %146 = math.tanh %145 : vector<16x32xf32>
    %147 = vector.extract_strided_slice %131 {offsets = [0, 96], sizes = [16, 32], strides = [1, 1]} : vector<16x128xf32> to vector<16x32xf32>
    %148 = arith.negf %147 : vector<16x32xf32>
    %149 = math.exp %148 : vector<16x32xf32>
    %cst_26 = arith.constant 1.000000e+00 : f32
    %150 = vector.broadcast %cst_26 : f32 to vector<16x32xf32>
    %151 = arith.addf %150, %149 : vector<16x32xf32>
    %152 = arith.divf %150, %151 : vector<16x32xf32>
    %153 = arith.mulf %144, %132 : vector<16x32xf32>
    %154 = arith.mulf %138, %146 : vector<16x32xf32>
    %155 = arith.addf %153, %154 : vector<16x32xf32>
    %156 = math.tanh %155 : vector<16x32xf32>
    %157 = arith.mulf %152, %156 : vector<16x32xf32>
    %158 = vector.extract_strided_slice %157 {offsets = [0, 0], sizes = [8, 32], strides = [1, 1]} : vector<16x32xf32> to vector<8x32xf32>
    %159 = vector.extract_strided_slice %157 {offsets = [8, 0], sizes = [8, 32], strides = [1, 1]} : vector<16x32xf32> to vector<8x32xf32>
    %160 = vector.extract_strided_slice %155 {offsets = [0, 0], sizes = [8, 32], strides = [1, 1]} : vector<16x32xf32> to vector<8x32xf32>
    %161 = vector.extract_strided_slice %155 {offsets = [8, 0], sizes = [8, 32], strides = [1, 1]} : vector<16x32xf32> to vector<8x32xf32>
    %162 = tpu.concatenate %158, %159 in 1 : vector<8x32xf32>, vector<8x32xf32> -> vector<8x64xf32>
    %163 = arith.truncf %162 : vector<8x64xf32> to vector<8x64xbf16>
    %cst_27 = arith.constant dense<0.000000e+00> : vector<8x256xf32>
    %164 = tpu.matmul %163, %8, %cst_27 {dimension_numbers = #tpu.dot_dimension_numbers<[1], [0], [0], [1], [0, 0, 1, 1], [], []>} : vector<8x64xbf16>, vector<64x256xbf16>, vector<8x256xf32> -> vector<8x256xf32>
    %165 = vector.extract_strided_slice %164 {offsets = [0, 0], sizes = [8, 128], strides = [1, 1]} : vector<8x256xf32> to vector<8x128xf32>
    %166 = vector.extract_strided_slice %7 {offsets = [0, 4, 0], sizes = [8, 1, 128], strides = [1, 1, 1]} : vector<8x8x128xf32> to vector<8x1x128xf32>
    %167 = vector.shape_cast %166 : vector<8x1x128xf32> to vector<8x128xf32>
    %168 = arith.addf %165, %167 : vector<8x128xf32>
    %169 = vector.extract_strided_slice %164 {offsets = [0, 128], sizes = [8, 128], strides = [1, 1]} : vector<8x256xf32> to vector<8x128xf32>
    %170 = arith.addf %169, %11 : vector<8x128xf32>
    %171 = tpu.concatenate %168, %170 in 0 : vector<8x128xf32>, vector<8x128xf32> -> vector<16x128xf32>
    %172 = tpu.concatenate %160, %161 in 0 : vector<8x32xf32>, vector<8x32xf32> -> vector<16x32xf32>
    %173 = vector.extract_strided_slice %171 {offsets = [0, 0], sizes = [16, 32], strides = [1, 1]} : vector<16x128xf32> to vector<16x32xf32>
    %174 = arith.negf %173 : vector<16x32xf32>
    %175 = math.exp %174 : vector<16x32xf32>
    %cst_28 = arith.constant 1.000000e+00 : f32
    %176 = vector.broadcast %cst_28 : f32 to vector<16x32xf32>
    %177 = arith.addf %176, %175 : vector<16x32xf32>
    %178 = arith.divf %176, %177 : vector<16x32xf32>
    %179 = vector.extract_strided_slice %171 {offsets = [0, 32], sizes = [16, 32], strides = [1, 1]} : vector<16x128xf32> to vector<16x32xf32>
    %180 = arith.negf %179 : vector<16x32xf32>
    %181 = math.exp %180 : vector<16x32xf32>
    %cst_29 = arith.constant 1.000000e+00 : f32
    %182 = vector.broadcast %cst_29 : f32 to vector<16x32xf32>
    %183 = arith.addf %182, %181 : vector<16x32xf32>
    %184 = arith.divf %182, %183 : vector<16x32xf32>
    %185 = vector.extract_strided_slice %171 {offsets = [0, 64], sizes = [16, 32], strides = [1, 1]} : vector<16x128xf32> to vector<16x32xf32>
    %186 = math.tanh %185 : vector<16x32xf32>
    %187 = vector.extract_strided_slice %171 {offsets = [0, 96], sizes = [16, 32], strides = [1, 1]} : vector<16x128xf32> to vector<16x32xf32>
    %188 = arith.negf %187 : vector<16x32xf32>
    %189 = math.exp %188 : vector<16x32xf32>
    %cst_30 = arith.constant 1.000000e+00 : f32
    %190 = vector.broadcast %cst_30 : f32 to vector<16x32xf32>
    %191 = arith.addf %190, %189 : vector<16x32xf32>
    %192 = arith.divf %190, %191 : vector<16x32xf32>
    %193 = arith.mulf %184, %172 : vector<16x32xf32>
    %194 = arith.mulf %178, %186 : vector<16x32xf32>
    %195 = arith.addf %193, %194 : vector<16x32xf32>
    %196 = math.tanh %195 : vector<16x32xf32>
    %197 = arith.mulf %192, %196 : vector<16x32xf32>
    %198 = vector.extract_strided_slice %197 {offsets = [0, 0], sizes = [8, 32], strides = [1, 1]} : vector<16x32xf32> to vector<8x32xf32>
    %199 = vector.extract_strided_slice %197 {offsets = [8, 0], sizes = [8, 32], strides = [1, 1]} : vector<16x32xf32> to vector<8x32xf32>
    %200 = vector.extract_strided_slice %195 {offsets = [0, 0], sizes = [8, 32], strides = [1, 1]} : vector<16x32xf32> to vector<8x32xf32>
    %201 = vector.extract_strided_slice %195 {offsets = [8, 0], sizes = [8, 32], strides = [1, 1]} : vector<16x32xf32> to vector<8x32xf32>
    %202 = tpu.concatenate %198, %199 in 1 : vector<8x32xf32>, vector<8x32xf32> -> vector<8x64xf32>
    %203 = arith.truncf %202 : vector<8x64xf32> to vector<8x64xbf16>
    %cst_31 = arith.constant dense<0.000000e+00> : vector<8x256xf32>
    %204 = tpu.matmul %203, %8, %cst_31 {dimension_numbers = #tpu.dot_dimension_numbers<[1], [0], [0], [1], [0, 0, 1, 1], [], []>} : vector<8x64xbf16>, vector<64x256xbf16>, vector<8x256xf32> -> vector<8x256xf32>
    %205 = vector.extract_strided_slice %204 {offsets = [0, 0], sizes = [8, 128], strides = [1, 1]} : vector<8x256xf32> to vector<8x128xf32>
    %206 = vector.extract_strided_slice %7 {offsets = [0, 5, 0], sizes = [8, 1, 128], strides = [1, 1, 1]} : vector<8x8x128xf32> to vector<8x1x128xf32>
    %207 = vector.shape_cast %206 : vector<8x1x128xf32> to vector<8x128xf32>
    %208 = arith.addf %205, %207 : vector<8x128xf32>
    %209 = vector.extract_strided_slice %204 {offsets = [0, 128], sizes = [8, 128], strides = [1, 1]} : vector<8x256xf32> to vector<8x128xf32>
    %210 = arith.addf %209, %11 : vector<8x128xf32>
    %211 = tpu.concatenate %208, %210 in 0 : vector<8x128xf32>, vector<8x128xf32> -> vector<16x128xf32>
    %212 = tpu.concatenate %200, %201 in 0 : vector<8x32xf32>, vector<8x32xf32> -> vector<16x32xf32>
    %213 = vector.extract_strided_slice %211 {offsets = [0, 0], sizes = [16, 32], strides = [1, 1]} : vector<16x128xf32> to vector<16x32xf32>
    %214 = arith.negf %213 : vector<16x32xf32>
    %215 = math.exp %214 : vector<16x32xf32>
    %cst_32 = arith.constant 1.000000e+00 : f32
    %216 = vector.broadcast %cst_32 : f32 to vector<16x32xf32>
    %217 = arith.addf %216, %215 : vector<16x32xf32>
    %218 = arith.divf %216, %217 : vector<16x32xf32>
    %219 = vector.extract_strided_slice %211 {offsets = [0, 32], sizes = [16, 32], strides = [1, 1]} : vector<16x128xf32> to vector<16x32xf32>
    %220 = arith.negf %219 : vector<16x32xf32>
    %221 = math.exp %220 : vector<16x32xf32>
    %cst_33 = arith.constant 1.000000e+00 : f32
    %222 = vector.broadcast %cst_33 : f32 to vector<16x32xf32>
    %223 = arith.addf %222, %221 : vector<16x32xf32>
    %224 = arith.divf %222, %223 : vector<16x32xf32>
    %225 = vector.extract_strided_slice %211 {offsets = [0, 64], sizes = [16, 32], strides = [1, 1]} : vector<16x128xf32> to vector<16x32xf32>
    %226 = math.tanh %225 : vector<16x32xf32>
    %227 = vector.extract_strided_slice %211 {offsets = [0, 96], sizes = [16, 32], strides = [1, 1]} : vector<16x128xf32> to vector<16x32xf32>
    %228 = arith.negf %227 : vector<16x32xf32>
    %229 = math.exp %228 : vector<16x32xf32>
    %cst_34 = arith.constant 1.000000e+00 : f32
    %230 = vector.broadcast %cst_34 : f32 to vector<16x32xf32>
    %231 = arith.addf %230, %229 : vector<16x32xf32>
    %232 = arith.divf %230, %231 : vector<16x32xf32>
    %233 = arith.mulf %224, %212 : vector<16x32xf32>
    %234 = arith.mulf %218, %226 : vector<16x32xf32>
    %235 = arith.addf %233, %234 : vector<16x32xf32>
    %236 = math.tanh %235 : vector<16x32xf32>
    %237 = arith.mulf %232, %236 : vector<16x32xf32>
    %238 = vector.extract_strided_slice %237 {offsets = [0, 0], sizes = [8, 32], strides = [1, 1]} : vector<16x32xf32> to vector<8x32xf32>
    %239 = vector.extract_strided_slice %237 {offsets = [8, 0], sizes = [8, 32], strides = [1, 1]} : vector<16x32xf32> to vector<8x32xf32>
    %240 = vector.extract_strided_slice %235 {offsets = [0, 0], sizes = [8, 32], strides = [1, 1]} : vector<16x32xf32> to vector<8x32xf32>
    %241 = vector.extract_strided_slice %235 {offsets = [8, 0], sizes = [8, 32], strides = [1, 1]} : vector<16x32xf32> to vector<8x32xf32>
    %242 = tpu.concatenate %238, %239 in 1 : vector<8x32xf32>, vector<8x32xf32> -> vector<8x64xf32>
    %243 = arith.truncf %242 : vector<8x64xf32> to vector<8x64xbf16>
    %cst_35 = arith.constant dense<0.000000e+00> : vector<8x256xf32>
    %244 = tpu.matmul %243, %8, %cst_35 {dimension_numbers = #tpu.dot_dimension_numbers<[1], [0], [0], [1], [0, 0, 1, 1], [], []>} : vector<8x64xbf16>, vector<64x256xbf16>, vector<8x256xf32> -> vector<8x256xf32>
    %245 = vector.extract_strided_slice %244 {offsets = [0, 0], sizes = [8, 128], strides = [1, 1]} : vector<8x256xf32> to vector<8x128xf32>
    %246 = vector.extract_strided_slice %7 {offsets = [0, 6, 0], sizes = [8, 1, 128], strides = [1, 1, 1]} : vector<8x8x128xf32> to vector<8x1x128xf32>
    %247 = vector.shape_cast %246 : vector<8x1x128xf32> to vector<8x128xf32>
    %248 = arith.addf %245, %247 : vector<8x128xf32>
    %249 = vector.extract_strided_slice %244 {offsets = [0, 128], sizes = [8, 128], strides = [1, 1]} : vector<8x256xf32> to vector<8x128xf32>
    %250 = arith.addf %249, %11 : vector<8x128xf32>
    %251 = tpu.concatenate %248, %250 in 0 : vector<8x128xf32>, vector<8x128xf32> -> vector<16x128xf32>
    %252 = tpu.concatenate %240, %241 in 0 : vector<8x32xf32>, vector<8x32xf32> -> vector<16x32xf32>
    %253 = vector.extract_strided_slice %251 {offsets = [0, 0], sizes = [16, 32], strides = [1, 1]} : vector<16x128xf32> to vector<16x32xf32>
    %254 = arith.negf %253 : vector<16x32xf32>
    %255 = math.exp %254 : vector<16x32xf32>
    %cst_36 = arith.constant 1.000000e+00 : f32
    %256 = vector.broadcast %cst_36 : f32 to vector<16x32xf32>
    %257 = arith.addf %256, %255 : vector<16x32xf32>
    %258 = arith.divf %256, %257 : vector<16x32xf32>
    %259 = vector.extract_strided_slice %251 {offsets = [0, 32], sizes = [16, 32], strides = [1, 1]} : vector<16x128xf32> to vector<16x32xf32>
    %260 = arith.negf %259 : vector<16x32xf32>
    %261 = math.exp %260 : vector<16x32xf32>
    %cst_37 = arith.constant 1.000000e+00 : f32
    %262 = vector.broadcast %cst_37 : f32 to vector<16x32xf32>
    %263 = arith.addf %262, %261 : vector<16x32xf32>
    %264 = arith.divf %262, %263 : vector<16x32xf32>
    %265 = vector.extract_strided_slice %251 {offsets = [0, 64], sizes = [16, 32], strides = [1, 1]} : vector<16x128xf32> to vector<16x32xf32>
    %266 = math.tanh %265 : vector<16x32xf32>
    %267 = vector.extract_strided_slice %251 {offsets = [0, 96], sizes = [16, 32], strides = [1, 1]} : vector<16x128xf32> to vector<16x32xf32>
    %268 = arith.negf %267 : vector<16x32xf32>
    %269 = math.exp %268 : vector<16x32xf32>
    %cst_38 = arith.constant 1.000000e+00 : f32
    %270 = vector.broadcast %cst_38 : f32 to vector<16x32xf32>
    %271 = arith.addf %270, %269 : vector<16x32xf32>
    %272 = arith.divf %270, %271 : vector<16x32xf32>
    %273 = arith.mulf %264, %252 : vector<16x32xf32>
    %274 = arith.mulf %258, %266 : vector<16x32xf32>
    %275 = arith.addf %273, %274 : vector<16x32xf32>
    %276 = math.tanh %275 : vector<16x32xf32>
    %277 = arith.mulf %272, %276 : vector<16x32xf32>
    %278 = vector.extract_strided_slice %277 {offsets = [0, 0], sizes = [8, 32], strides = [1, 1]} : vector<16x32xf32> to vector<8x32xf32>
    %279 = vector.extract_strided_slice %277 {offsets = [8, 0], sizes = [8, 32], strides = [1, 1]} : vector<16x32xf32> to vector<8x32xf32>
    %280 = vector.extract_strided_slice %275 {offsets = [0, 0], sizes = [8, 32], strides = [1, 1]} : vector<16x32xf32> to vector<8x32xf32>
    %281 = vector.extract_strided_slice %275 {offsets = [8, 0], sizes = [8, 32], strides = [1, 1]} : vector<16x32xf32> to vector<8x32xf32>
    %282 = tpu.concatenate %278, %279 in 1 : vector<8x32xf32>, vector<8x32xf32> -> vector<8x64xf32>
    %283 = arith.truncf %282 : vector<8x64xf32> to vector<8x64xbf16>
    %cst_39 = arith.constant dense<0.000000e+00> : vector<8x256xf32>
    %284 = tpu.matmul %283, %8, %cst_39 {dimension_numbers = #tpu.dot_dimension_numbers<[1], [0], [0], [1], [0, 0, 1, 1], [], []>} : vector<8x64xbf16>, vector<64x256xbf16>, vector<8x256xf32> -> vector<8x256xf32>
    %285 = vector.extract_strided_slice %284 {offsets = [0, 0], sizes = [8, 128], strides = [1, 1]} : vector<8x256xf32> to vector<8x128xf32>
    %286 = vector.extract_strided_slice %7 {offsets = [0, 7, 0], sizes = [8, 1, 128], strides = [1, 1, 1]} : vector<8x8x128xf32> to vector<8x1x128xf32>
    %287 = vector.shape_cast %286 : vector<8x1x128xf32> to vector<8x128xf32>
    %288 = arith.addf %285, %287 : vector<8x128xf32>
    %289 = vector.extract_strided_slice %284 {offsets = [0, 128], sizes = [8, 128], strides = [1, 1]} : vector<8x256xf32> to vector<8x128xf32>
    %290 = arith.addf %289, %11 : vector<8x128xf32>
    %291 = tpu.concatenate %288, %290 in 0 : vector<8x128xf32>, vector<8x128xf32> -> vector<16x128xf32>
    %292 = tpu.concatenate %280, %281 in 0 : vector<8x32xf32>, vector<8x32xf32> -> vector<16x32xf32>
    %293 = vector.extract_strided_slice %291 {offsets = [0, 0], sizes = [16, 32], strides = [1, 1]} : vector<16x128xf32> to vector<16x32xf32>
    %294 = arith.negf %293 : vector<16x32xf32>
    %295 = math.exp %294 : vector<16x32xf32>
    %cst_40 = arith.constant 1.000000e+00 : f32
    %296 = vector.broadcast %cst_40 : f32 to vector<16x32xf32>
    %297 = arith.addf %296, %295 : vector<16x32xf32>
    %298 = arith.divf %296, %297 : vector<16x32xf32>
    %299 = vector.extract_strided_slice %291 {offsets = [0, 32], sizes = [16, 32], strides = [1, 1]} : vector<16x128xf32> to vector<16x32xf32>
    %300 = arith.negf %299 : vector<16x32xf32>
    %301 = math.exp %300 : vector<16x32xf32>
    %cst_41 = arith.constant 1.000000e+00 : f32
    %302 = vector.broadcast %cst_41 : f32 to vector<16x32xf32>
    %303 = arith.addf %302, %301 : vector<16x32xf32>
    %304 = arith.divf %302, %303 : vector<16x32xf32>
    %305 = vector.extract_strided_slice %291 {offsets = [0, 64], sizes = [16, 32], strides = [1, 1]} : vector<16x128xf32> to vector<16x32xf32>
    %306 = math.tanh %305 : vector<16x32xf32>
    %307 = vector.extract_strided_slice %291 {offsets = [0, 96], sizes = [16, 32], strides = [1, 1]} : vector<16x128xf32> to vector<16x32xf32>
    %308 = arith.negf %307 : vector<16x32xf32>
    %309 = math.exp %308 : vector<16x32xf32>
    %cst_42 = arith.constant 1.000000e+00 : f32
    %310 = vector.broadcast %cst_42 : f32 to vector<16x32xf32>
    %311 = arith.addf %310, %309 : vector<16x32xf32>
    %312 = arith.divf %310, %311 : vector<16x32xf32>
    %313 = arith.mulf %304, %292 : vector<16x32xf32>
    %314 = arith.mulf %298, %306 : vector<16x32xf32>
    %315 = arith.addf %313, %314 : vector<16x32xf32>
    %316 = math.tanh %315 : vector<16x32xf32>
    %317 = arith.mulf %312, %316 : vector<16x32xf32>
    %318 = vector.extract_strided_slice %317 {offsets = [0, 0], sizes = [8, 32], strides = [1, 1]} : vector<16x32xf32> to vector<8x32xf32>
    %319 = vector.extract_strided_slice %317 {offsets = [8, 0], sizes = [8, 32], strides = [1, 1]} : vector<16x32xf32> to vector<8x32xf32>
    %320 = vector.extract_strided_slice %315 {offsets = [8, 0], sizes = [8, 32], strides = [1, 1]} : vector<16x32xf32> to vector<8x32xf32>
    %321 = tpu.concatenate %318, %319 in 1 : vector<8x32xf32>, vector<8x32xf32> -> vector<8x64xf32>
    %322 = arith.truncf %321 : vector<8x64xf32> to vector<8x64xbf16>
    %cst_43 = arith.constant dense<0.000000e+00> : vector<8x256xf32>
    %323 = tpu.matmul %322, %8, %cst_43 {dimension_numbers = #tpu.dot_dimension_numbers<[1], [0], [0], [1], [0, 0, 1, 1], [], []>} : vector<8x64xbf16>, vector<64x256xbf16>, vector<8x256xf32> -> vector<8x256xf32>
    %324 = vector.extract_strided_slice %323 {offsets = [0, 128], sizes = [8, 128], strides = [1, 1]} : vector<8x256xf32> to vector<8x128xf32>
    %325 = arith.addf %324, %11 : vector<8x128xf32>
    %326 = vector.extract_strided_slice %325 {offsets = [0, 0], sizes = [8, 32], strides = [1, 1]} : vector<8x128xf32> to vector<8x32xf32>
    %327 = arith.negf %326 : vector<8x32xf32>
    %328 = math.exp %327 : vector<8x32xf32>
    %cst_44 = arith.constant 1.000000e+00 : f32
    %329 = vector.broadcast %cst_44 : f32 to vector<8x32xf32>
    %330 = arith.addf %329, %328 : vector<8x32xf32>
    %331 = arith.divf %329, %330 : vector<8x32xf32>
    %332 = vector.extract_strided_slice %325 {offsets = [0, 32], sizes = [8, 32], strides = [1, 1]} : vector<8x128xf32> to vector<8x32xf32>
    %333 = arith.negf %332 : vector<8x32xf32>
    %334 = math.exp %333 : vector<8x32xf32>
    %cst_45 = arith.constant 1.000000e+00 : f32
    %335 = vector.broadcast %cst_45 : f32 to vector<8x32xf32>
    %336 = arith.addf %335, %334 : vector<8x32xf32>
    %337 = arith.divf %335, %336 : vector<8x32xf32>
    %338 = vector.extract_strided_slice %325 {offsets = [0, 64], sizes = [8, 32], strides = [1, 1]} : vector<8x128xf32> to vector<8x32xf32>
    %339 = math.tanh %338 : vector<8x32xf32>
    %340 = vector.extract_strided_slice %325 {offsets = [0, 96], sizes = [8, 32], strides = [1, 1]} : vector<8x128xf32> to vector<8x32xf32>
    %341 = arith.negf %340 : vector<8x32xf32>
    %342 = math.exp %341 : vector<8x32xf32>
    %cst_46 = arith.constant 1.000000e+00 : f32
    %343 = vector.broadcast %cst_46 : f32 to vector<8x32xf32>
    %344 = arith.addf %343, %342 : vector<8x32xf32>
    %345 = arith.divf %343, %344 : vector<8x32xf32>
    %346 = arith.mulf %337, %320 : vector<8x32xf32>
    %347 = arith.mulf %331, %339 : vector<8x32xf32>
    %348 = arith.addf %346, %347 : vector<8x32xf32>
    %349 = math.tanh %348 : vector<8x32xf32>
    %350 = arith.mulf %345, %349 : vector<8x32xf32>
    %351 = tpu.concatenate %79, %119, %159, %199, %239, %279, %319, %350 in 1 : vector<8x32xf32>, vector<8x32xf32>, vector<8x32xf32>, vector<8x32xf32>, vector<8x32xf32>, vector<8x32xf32>, vector<8x32xf32>, vector<8x32xf32> -> vector<8x256xf32>
    %352 = arith.truncf %351 : vector<8x256xf32> to vector<8x256xbf16>
    %c0_47 = arith.constant 0 : index
    %c0_48 = arith.constant 0 : index
    %353 = vector.load %arg6[%c0_47, %c0_48] : memref<256x4xbf16, #tpu.memory_space<vmem>>, vector<256x4xbf16>
    %cst_49 = arith.constant dense<0.000000e+00> : vector<8x4xf32>
    %354 = tpu.matmul %352, %353, %cst_49 {dimension_numbers = #tpu.dot_dimension_numbers<[1], [0], [0], [1], [0, 0, 1, 1], [], []>} : vector<8x256xbf16>, vector<256x4xbf16>, vector<8x4xf32> -> vector<8x4xf32>
    %c0_50 = arith.constant 0 : index
    %c0_51 = arith.constant 0 : index
    %355 = vector.load %arg7[%c0_50, %c0_51] : memref<1x4xf32, #tpu.memory_space<vmem>>, vector<1x4xf32>
    %356 = vector.broadcast %355 : vector<1x4xf32> to vector<8x4xf32>
    %357 = arith.addf %354, %356 : vector<8x4xf32>
    %cst_52 = arith.constant dense<0xFF800000> : vector<8xf32>
    %358 = vector.multi_reduction <maximumf>, %357, %cst_52 [1] : vector<8x4xf32> to vector<8xf32>
    %359 = vector.shape_cast %358 : vector<8xf32> to vector<8x1xf32>
    %360 = vector.broadcast %359 : vector<8x1xf32> to vector<8x4xf32>
    %361 = arith.subf %357, %360 : vector<8x4xf32>
    %362 = math.exp %361 : vector<8x4xf32>
    %cst_53 = arith.constant dense<0.000000e+00> : vector<8xf32>
    %363 = vector.multi_reduction <add>, %362, %cst_53 [1] : vector<8x4xf32> to vector<8xf32>
    %364 = vector.shape_cast %363 : vector<8xf32> to vector<8x1xf32>
    %365 = vector.broadcast %364 : vector<8x1xf32> to vector<8x4xf32>
    %366 = arith.divf %362, %365 : vector<8x4xf32>
    %c0_54 = arith.constant 0 : index
    %c0_55 = arith.constant 0 : index
    %367 = vector.load %arg8[%c0_54, %c0_55] : memref<8x4xf32, #tpu.memory_space<vmem>>, vector<8x4xf32>
    tpu.vector_store %arg8[%c0_54, %c0_55], %366 {strides = array<i32>} : memref<8x4xf32, #tpu.memory_space<vmem>>, vector<8x4xf32>,
    return
  }
  func.func @transform_0(%arg0: i32) -> (i32, i32) {
    %c0_i32 = arith.constant 0 : i32
    %c0_i32_0 = arith.constant 0 : i32
    return %arg0, %c0_i32 : i32, i32
  }
  func.func @transform_1(%arg0: i32) -> (i32, i32) {
    %c0_i32 = arith.constant 0 : i32
    %c0_i32_0 = arith.constant 0 : i32
    %c0_i32_1 = arith.constant 0 : i32
    return %c0_i32, %c0_i32_0 : i32, i32
  }
  func.func @transform_2(%arg0: i32) -> (i32, i32) {
    %c0_i32 = arith.constant 0 : i32
    %c0_i32_0 = arith.constant 0 : i32
    %c0_i32_1 = arith.constant 0 : i32
    return %c0_i32, %c0_i32_0 : i32, i32
  }
  func.func @transform_3(%arg0: i32) -> (i32, i32) {
    %c0_i32 = arith.constant 0 : i32
    %c0_i32_0 = arith.constant 0 : i32
    %c0_i32_1 = arith.constant 0 : i32
    return %c0_i32, %c0_i32_0 : i32, i32
  }
  func.func @transform_4(%arg0: i32) -> (i32, i32) {
    %c0_i32 = arith.constant 0 : i32
    %c0_i32_0 = arith.constant 0 : i32
    %c0_i32_1 = arith.constant 0 : i32
    return %c0_i32, %c0_i32_0 : i32, i32
  }
  func.func @transform_5(%arg0: i32) -> (i32, i32) {
    %c0_i32 = arith.constant 0 : i32
    %c0_i32_0 = arith.constant 0 : i32
    %c0_i32_1 = arith.constant 0 : i32
    return %c0_i32, %c0_i32_0 : i32, i32
  }
  func.func @transform_6(%arg0: i32) -> (i32, i32) {
    %c0_i32 = arith.constant 0 : i32
    %c0_i32_0 = arith.constant 0 : i32
    %c0_i32_1 = arith.constant 0 : i32
    return %c0_i32, %c0_i32_0 : i32, i32
  }
  func.func @transform_7(%arg0: i32) -> (i32, i32) {
    %c0_i32 = arith.constant 0 : i32
    %c0_i32_0 = arith.constant 0 : i32
    return %arg0, %c0_i32 : i32, i32
  }
}

</mosaic_0001>

<bundles_post_ra>
// kernel: lstm_model_forward.1
= control target key start
LH: loop header
LB: loop body
LE: loop exit
PB: predicated region body
PF: predicated region fallthrough
CT: control target
= control target key end

     0   :  { %12 = vsyncpa [#allocation3], 0  ;;  %s2576_s0 = inlined_call_operand.hbm [shape: f32[64,16], index: 0, kind: input, shape index: {}]   ;;  %s2577_s1 = inlined_call_operand.hbm [shape: bf16[16,128], index: 1, kind: input, shape index: {}]   ;;  %s2578_s2 = inlined_call_operand.hbm [shape: bf16[64,256], index: 2, kind: input, shape index: {}]   ;;  %s2579_s3 = inlined_call_operand.vmem [shape: f32[1,128], index: 3, kind: input, shape index: {}]   ;;  %s2580_s4 = inlined_call_operand.vmem [shape: f32[1,128], index: 4, kind: input, shape index: {}]   ;;  %s2581_s5 = inlined_call_operand.hbm [shape: bf16[256,4], index: 5, kind: input, shape index: {}]   ;;  %s2582_s6 = inlined_call_operand.vmem [shape: f32[1,4], index: 6, kind: input, shape index: {}]   ;;  %s2583_s7 = inlined_call_operand.vmem [shape: f32[8,4], index: 7, kind: output, shape index: {}]  }
   0x1   :  { %13 = vsyncpa [#allocation5], 0 }
   0x2   :  { %14 = vsyncpa [#allocation8], 0  ;;  %s2042_s24 = smov [#allocation4]  }
   0x3   :  { %s32_s25 = sshll.u32 %s2042_s24, 4  ;;  %s33_s25 = int_to_ptr.vmem [resolvable:$true] %s32_s25 }
   0x4   :  { %s1964_s26 = scalar_lea.vmem %s33_s25, 128  ;;  %p1969_p1 = scmp.lt.s32.totalorder %s33_s25, %s33_s25 }
   0x5   :  { %p1965_p0 = scmp.ne.s32.totalorder %s33_s25, %s1964_s26  ;;  %p1970_p2 = scmp.lt.s32.totalorder %s1964_s26, %s1964_s26 }
   0x7   :  { %p1971_p3 = por %p1970_p2, %p1969_p1 }
   0x9   :  { %p1972_p4 = pnand %p1971_p3, %p1965_p0 }
   0xb   :  { %1975 = shalt.err (!%p1972_p4)
}
   0xc   :  { %s2043_s27 = smov 64   ;;  %s2044_s28 = smov 4  }
   0xd   :  { %38 = dma.hbm_to_vmem [thread:$0]  %s2577_s1, 128, %s33_s25, [#allocation5], %s2043_s27, %s2043_s27, %s2044_s28  }
   0xe   :  { %s2045_s8 = smov [#allocation2]  }
   0xf   :  { %s20_s9 = sshll.u32 %s2045_s8, 4  ;;  %s21_s9 = int_to_ptr.vmem [resolvable:$true] %s20_s9 }
  0x10   :  { %s1984_s10 = scalar_lea.vmem %s21_s9, 1024  ;;  %p1989_p6 = scmp.lt.s32.totalorder %s21_s9, %s21_s9 }
  0x11   :  { %p1985_p5 = scmp.ne.s32.totalorder %s21_s9, %s1984_s10  ;;  %p1990_p7 = scmp.lt.s32.totalorder %s1984_s10, %s1984_s10 }
  0x13   :  { %p1991_p8 = por %p1990_p7, %p1989_p6 }
  0x15   :  { %p1992_p9 = pnand %p1991_p8, %p1985_p5 }
  0x17   :  { %1995 = shalt.err (!%p1992_p9)
}
  0x18   :  { %s2046_s11 = smov 128   ;;  %s2047_s12 = smov 8  }
  0x19   :  { %26 = dma.hbm_to_vmem [thread:$0]  %s2576_s0, 1024, %s21_s9, [#allocation3], %s2046_s11, %s2046_s11, %s2047_s12  }
  0x1a   :  { %s2048_s15 = smov [#allocation6]   ;;  %s2049_s17 = smov [#allocation7]  }
  0x1b   :  { %s44_s16 = sshll.u32 %s2048_s15, 4  ;;  %s60_s1 = sshll.u32 %s2049_s17, 4  ;;  %s45_s16 = int_to_ptr.vmem [resolvable:$true] %s44_s16  ;;  %s61_s1 = int_to_ptr.vmem [resolvable:$true] %s60_s1 }
  0x1c   :  { %s2004_s18 = scalar_lea.vmem %s45_s16, 1024  ;;  %p2009_p11 = scmp.lt.s32.totalorder %s45_s16, %s45_s16 }
  0x1d   :  { %p2005_p10 = scmp.ne.s32.totalorder %s45_s16, %s2004_s18  ;;  %p2010_p12 = scmp.lt.s32.totalorder %s2004_s18, %s2004_s18 }
  0x1f   :  { %p2011_p13 = por %p2010_p12, %p2009_p11 }
  0x21   :  { %p2012_p0 = pnand %p2011_p13, %p2005_p10 }
  0x23   :  { %2015 = shalt.err (!%p2012_p0)
}
  0x24   :  { %50 = dma.hbm_to_vmem [thread:$0]  %s2578_s2, 1024, %s45_s16, [#allocation5], %s2046_s11, %s2046_s11, %s2047_s12  }
  0x25   :  { %s2024_s21 = scalar_lea.vmem %s61_s1, 2048  ;;  %p2029_p2 = scmp.lt.s32.totalorder %s61_s1, %s61_s1 }
  0x26   :  { %p2025_p1 = scmp.ne.s32.totalorder %s61_s1, %s2024_s21  ;;  %p2030_p3 = scmp.lt.s32.totalorder %s2024_s21, %s2024_s21 }
  0x28   :  { %p2031_p4 = por %p2030_p3, %p2029_p2 }
  0x2a   :  { %p2032_p5 = pnand %p2031_p4, %p2025_p1 }
  0x2c   :  { %2035 = shalt.err (!%p2032_p5)
}
  0x2d   :  { %66 = dma.hbm_to_vmem [thread:$0]  %s2581_s5, 2048, %s61_s1, [#allocation8], %s2043_s27, %s2043_s27, %s2044_s28  }
  0x2e   :  { %2036 = dma.done.wait [#allocation3], 1024  }
  0x2f   :  { %2037 = vsyncadd [#allocation3], 4294966272 }
  0x30   :  { %2038 = dma.done.wait [#allocation5], 1152  }
  0x31   :  { %2039 = vsyncadd [#allocation5], 4294966144 }
  0x32   :  { %2040 = dma.done.wait [#allocation8], 2048  }
  0x33   :  { %2041 = vsyncadd [#allocation8], 4294965248  ;;  %v1739_v0 = vld [vmem:[#allocation4] sm:$0xff]   ;;  %v83_v2 = vld [vmem:[#allocation2 + $0x8] sm:$0xff]  ;;  %vm109_vm0 = vcmask 130048   ;;  %vm403_vm1 = vcmask 1041409  }
  0x34   :  { %v82_v1 = vld [vmem:[#allocation2] sm:$0xff]  ;;  %v84_v3 = vld [vmem:[#allocation2 + $0x10] sm:$0xff]  ;;  %1708 = vmatprep.subr.bf16.mxu0 %v1739_v0  ;;  %v85_v5 = vld [vmem:[#allocation2 + $0x18] sm:$0xff]  ;;  %vm406_vm2 = vcmask 1042434   ;;  %vm409_vm3 = vcmask 1043459   ;;  %vm412_vm4 = vcmask 1044484  }
  0x35   :  { %v90_v4 = vpack.c.bf16 %v83_v2, %v82_v1  ;;  %v86_v6 = vld [vmem:[#allocation2 + $0x20] sm:$0xff]  ;;  %v87_v7 = vld [vmem:[#allocation2 + $0x28] sm:$0xff]  ;;  %1709 = vmatpush3.bf16.msra.mxu0 %v1739_v0  ;;  %v91_v8 = vpack.c.bf16 %v85_v5, %v84_v3  ;;  %v88_v10 = vld [vmem:[#allocation2 + $0x30] sm:$0xff]  ;;  %vm415_vm5 = vcmask 1045509   ;;  %vm418_vm6 = vcmask 1046534  }
  0x36   :  { %v92_v9 = vpack.c.bf16 %v87_v7, %v86_v6  ;;  %v89_v11 = vld [vmem:[#allocation2 + $0x38] sm:$0xff]  ;;  %v1618_v13 = vld [vmem:[%s2579_s3] ss:$0 sm:$0xff]  ;;  %vm421_vm7 = vcmask 1047559   ;;  %s2050_s3 = smov 32   ;;  %vm426_vm8 = vcmask 261120  }
  0x37   :  { %1710 = vmatprep.mubr.msk.bf16.mxu0 %vm109_vm0, %v90_v4  ;;  %v93_v12 = vpack.c.bf16 %v89_v11, %v88_v10  ;;  %vm469_vm9 = vcmask 523264   ;;  %vm1416_vm10 = vcmask 785408   ;;  %vm1598_vm11 = vcmask 31744  }
  0x38   :  { %1711 = vmatmul.mubr.msk.bf16.vlgmr.msra.gmra.mxu0 %vm109_vm0, %v91_v8 }
  0x39   :  { %1714 = vmatprep.mubr.msk.bf16.mxu0 %vm109_vm0, %v92_v9 }
  0x40   :  { %1715 = vmatmul.mubr.msk.bf16.gmra.mxu0 %vm109_vm0, %v93_v12 }
  0xf8   :  { %v1712_v14 = vpop.f32.mrf.mxu0 }
  0xf9   :  { %v2118_v15 = vadd.f32 %v1712_v14, %v1618_v13 }
  0xfa   :  { %v156_v16 = vpop.f32.mrf.mxu0 }
  0xfb   :  { %v2120_v17 = vadd.f32 %v1618_v13, %v156_v16  ;;  %1768 = vtanh.f32 %v2118_v15  ;;  %v524_v24 = vrot.slane %v2118_v15, 7  ;;  %v786_v50 = vrot.slane %v2118_v15, 1 }
  0xfc   :  { %v1713_v18 = vpop.f32.mrf.mxu0  ;;  %v905_v14 = vrot.slane %v2118_v15, 2 }
  0xfd   :  { %v2123_v19 = vadd.f32 %v1713_v18, %v1618_v13  ;;  %1770 = vtanh.f32 %v2120_v17  ;;  %v522_v22 = vrot.slane %v2120_v17, 1  ;;  %v664_v29 = vrot.slane %v2120_v17, 2 }
  0xfe   :  { %v159_v20 = vpop.f32.mrf.mxu0  ;;  %v783_v37 = vrot.slane %v2120_v17, 3  ;;  %v902_v11 = vrot.slane %v2120_v17, 4 }
  0xff   :  { %v2126_v21 = vadd.f32 %v1618_v13, %v159_v20  ;;  %1772 = vtanh.f32 %v2123_v19  ;;  %v526_v26 = vrot.slane %v2123_v19, 6  ;;  %v668_v39 = vrot.slane %v2123_v19, 7 }
 0x100   :  { %v1716_v23 = vpop.f32.mrf.mxu0  ;;  %v907_v16 = vrot.slane %v2123_v19, 1 }
 0x101   :  { %1774 = vtanh.f32 %v2126_v21  ;;  %v523_v25 = vsel %vm403_vm1, %v2126_v21, %v522_v22  ;;  %v665_v30 = vrot.slane %v2126_v21, 1  ;;  %v784_v31 = vrot.slane %v2126_v21, 2 }
 0x102   :  { %v172_v27 = vpop.f32.mrf.mxu0  ;;  %v525_v28 = vsel %vm406_vm2, %v524_v24, %v523_v25  ;;  %v2142_v34 = vadd.f32 %v1716_v23, %v1618_v13  ;;  %v903_v12 = vrot.slane %v2126_v21, 3  ;;  %v1021_v22 = vrot.slane %v2120_v17, 5 }
 0x103   :  { %v2139_v32 = vadd.f32 %v1618_v13, %v172_v27  ;;  %v527_v33 = vsel %vm409_vm3, %v526_v26, %v525_v28  ;;  %v666_v36 = vsel %vm403_vm1, %v665_v30, %v664_v29  ;;  %v785_v44 = vsel %vm403_vm1, %v784_v31, %v783_v37 }
 0x104   :  { %v1717_v35 = vpop.f32.mrf.mxu0  ;;  %v667_v42 = vsel %vm406_vm2, %v2118_v15, %v666_v36  ;;  %v532_v48 = vrot.slane %v2142_v34, 3  ;;  %v674_v53 = vrot.slane %v2142_v34, 4  ;;  %v787_v56 = vsel %vm406_vm2, %v786_v50, %v785_v44 }
 0x105   :  { %1776 = vtanh.f32 %v2139_v32  ;;  %v528_v38 = vrot.slane %v2139_v32, 5  ;;  %v2149_v40 = vadd.f32 %v1717_v35, %v1618_v13  ;;  %v670_v43 = vrot.slane %v2139_v32, 6 }
 0x106   :  { %v175_v41 = vpop.f32.mrf.mxu0  ;;  %1778 = vtanh.f32 %v2142_v34  ;;  %v669_v49 = vsel %vm409_vm3, %v668_v39, %v667_v42  ;;  %v789_v57 = vrot.slane %v2139_v32, 7  ;;  %v788_v60 = vsel %vm409_vm3, %v2123_v19, %v787_v56 }
 0x107   :  { %v2155_v45 = vadd.f32 %v1618_v13, %v175_v41  ;;  %v529_v46 = vsel %vm412_vm4, %v528_v38, %v527_v33  ;;  %v671_v52 = vsel %vm412_vm4, %v670_v43, %v669_v49  ;;  %v534_v59 = vrot.slane %v2149_v40, 2 }
 0x108   :  { %v1769_v47 = vpop.eup %1768  ;;  %v676_v0 = vrot.slane %v2149_v40, 3  ;;  %v790_v1 = vsel %vm412_vm4, %v789_v57, %v788_v60  ;;  %v793_v6 = vrot.slane %v2142_v34, 5  ;;  %v795_v9 = vrot.slane %v2149_v40, 4 }
 0x109   :  { %278 = vrot.lane.b32.xlu0 %v1769_v47, %s2043_s27  ;;  %1780 = vtanh.f32 %v2155_v45  ;;  %v530_v51 = vrot.slane %v2155_v45, 4  ;;  %v672_v55 = vrot.slane %v2155_v45, 5  ;;  %v791_v61 = vrot.slane %v2155_v45, 6 }
 0x10a   :  { %v1771_v54 = vpop.eup %1770  ;;  %1782 = vtanh.f32 %v2149_v40  ;;  %v904_v18 = vsel %vm403_vm1, %v903_v12, %v902_v11  ;;  %v910_v20 = vrot.slane %v2155_v45, 7  ;;  %v1022_v23 = vrot.slane %v2126_v21, 4 }
 0x10b   :  { %274 = vrot.lane.b32.xlu1 %v1771_v54, %s2043_s27  ;;  %v531_v58 = vsel %vm415_vm5, %v530_v51, %v529_v46  ;;  %v673_v63 = vsel %vm415_vm5, %v672_v55, %v671_v52  ;;  %v792_v5 = vsel %vm415_vm5, %v791_v61, %v790_v1  ;;  %v906_v25 = vsel %vm406_vm2, %v905_v14, %v904_v18 }
 0x10c   :  { %v533_v62 = vsel %vm418_vm6, %v532_v48, %v531_v58  ;;  %v1773_v2 = vpop.eup %1772  ;;  %v675_v4 = vsel %vm418_vm6, %v674_v53, %v673_v63  ;;  %v794_v10 = vsel %vm418_vm6, %v793_v6, %v792_v5  ;;  %v1024_v26 = vrot.slane %v2118_v15, 3 }
 0x10d   :  { %v2182_v3 = vsel %vm421_vm7, %v534_v59, %v533_v62  ;;  %v2188_v8 = vsel %vm421_vm7, %v676_v0, %v675_v4  ;;  %v2197_v13 = vsel %vm421_vm7, %v795_v9, %v794_v10  ;;  %v1028_v27 = vrot.slane %v2139_v32, 1 }
 0x10e   :  { %v1775_v7 = vpop.eup %1774  ;;  %v1143_v28 = vrot.slane %v2118_v15, 4  ;;  %v908_v29 = vsel %vm409_vm3, %v907_v16, %v906_v25  ;;  %v912_v30 = vrot.slane %v2142_v34, 6  ;;  %v1023_v31 = vsel %vm403_vm1, %v1022_v23, %v1021_v22 }
 0x10f   :  { %276 = vrot.lane.b32.xlu0 %v1775_v7, %s2043_s27  ;;  %280 = vrot.lane.b32.xlu1 %v1773_v2, %s2043_s27  ;;  %v1026_v33 = vrot.slane %v2123_v19, 2  ;;  %v909_v35 = vsel %vm412_vm4, %v2139_v32, %v908_v29  ;;  %v914_v36 = vrot.slane %v2149_v40, 5  ;;  %v1025_v37 = vsel %vm406_vm2, %v1024_v26, %v1023_v31 }
 0x110   :  { %v1031_v38 = vrot.slane %v2142_v34, 7  ;;  %v911_v41 = vsel %vm415_vm5, %v910_v20, %v909_v35  ;;  %v1140_v43 = vrot.slane %v2120_v17, 6  ;;  %v1141_v44 = vrot.slane %v2126_v21, 5 }
 0x111   :  { %v1027_v42 = vsel %vm409_vm3, %v1026_v33, %v1025_v37  ;;  %v913_v47 = vsel %vm418_vm6, %v912_v30, %v911_v41  ;;  %v1033_v49 = vrot.slane %v2149_v40, 6  ;;  %v1145_v50 = vrot.slane %v2123_v19, 3 }
 0x112   :  { %v1777_v24 = vpop.eup %1776  ;;  %v1029_v48 = vsel %vm412_vm4, %v1028_v27, %v1027_v42  ;;  %v2230_v52 = vsel %vm421_vm7, %v914_v36, %v913_v47  ;;  %v1142_v54 = vsel %vm403_vm1, %v1141_v44, %v1140_v43  ;;  %v1147_v55 = vrot.slane %v2139_v32, 2 }
 0x113   :  { %282 = vrot.lane.b32.xlu0 %v1777_v24, %s2043_s27  ;;  %v1779_v39 = vpop.eup %1778  ;;  %v1030_v53 = vsel %vm415_vm5, %v2155_v45, %v1029_v48  ;;  %v1144_v57 = vsel %vm406_vm2, %v1143_v28, %v1142_v54  ;;  %v1149_v60 = vrot.slane %v2155_v45, 1  ;;  %v1152_v63 = vrot.slane %v2149_v40, 7 }
 0x114   :  { %v1032_v56 = vsel %vm418_vm6, %v1031_v38, %v1030_v53  ;;  %v1146_v59 = vsel %vm409_vm3, %v1145_v50, %v1144_v57  ;;  %v1259_v0 = vrot.slane %v2120_v17, 7  ;;  %v1260_v1 = vrot.slane %v2126_v21, 6 }
 0x115   :  { %v2239_v58 = vsel %vm421_vm7, %v1033_v49, %v1032_v56  ;;  %v1148_v61 = vsel %vm412_vm4, %v1147_v55, %v1146_v59  ;;  %v1262_v4 = vrot.slane %v2118_v15, 5  ;;  %v1266_v5 = vrot.slane %v2139_v32, 3 }
 0x116   :  { %v1781_v46 = vpop.eup %1780  ;;  %v1150_v62 = vsel %vm415_vm5, %v1149_v60, %v1148_v61  ;;  %v1261_v7 = vsel %vm403_vm1, %v1260_v1, %v1259_v0  ;;  %v1264_v9 = vrot.slane %v2123_v19, 4  ;;  %v1268_v10 = vrot.slane %v2155_v45, 2 }
 0x117   :  { %v1783_v51 = vpop.eup %1782  ;;  %286 = vrot.lane.b32.xlu0 %v1779_v39, %s2043_s27  ;;  %284 = vrot.lane.b32.xlu1 %v1781_v46, %s2043_s27  ;;  %v1151_v2 = vsel %vm418_vm6, %v2142_v34, %v1150_v62  ;;  %v1263_v11 = vsel %vm406_vm2, %v1262_v4, %v1261_v7  ;;  %v1270_v16 = vrot.slane %v2142_v34, 1  ;;  %v1627_v23 = vmul.f32 -1.442695, %v2118_v15 }
 0x118   :  { %v2254_v6 = vsel %vm421_vm7, %v1152_v63, %v1151_v2  ;;  %v1265_v12 = vsel %vm409_vm3, %v1264_v9, %v1263_v11  ;;  %v1625_v24 = vmul.f32 -1.442695, %v2120_v17  ;;  %v1628_v25 = vmul.f32 -1.442695, %v2123_v19 }
 0x119   :  { %v1267_v14 = vsel %vm412_vm4, %v1266_v5, %v1265_v12  ;;  %1784 = vpow2.f32 %v1627_v23  ;;  %v1626_v26 = vmul.f32 -1.442695, %v2126_v21  ;;  %v1629_v27 = vmul.f32 -1.442695, %v2139_v32 }
 0x11a   :  { %v1269_v18 = vsel %vm415_vm5, %v1268_v10, %v1267_v14  ;;  %1786 = vpow2.f32 %v1625_v24  ;;  %v1631_v28 = vmul.f32 -1.442695, %v2142_v34  ;;  %v1630_v29 = vmul.f32 -1.442695, %v2155_v45 }
 0x11b   :  { %288 = vrot.lane.b32.xlu1 %v1783_v51, %s2043_s27  ;;  %v1271_v20 = vsel %vm418_vm6, %v1270_v16, %v1269_v18  ;;  %1788 = vpow2.f32 %v1628_v25  ;;  %v1632_v15 = vmul.f32 -1.442695, %v2149_v40 }
 0x11c   :  { %v2267_v22 = vsel %vm421_vm7, %v2149_v40, %v1271_v20  ;;  %1790 = vpow2.f32 %v1626_v26 }
 0x11d   :  { %1792 = vpow2.f32 %v1629_v27 }
 0x11e   :  { %1794 = vpow2.f32 %v1631_v28 }
 0x11f   :  { %1796 = vpow2.f32 %v1630_v29 }
 0x120   :  { %1798 = vpow2.f32 %v1632_v15 }
 0x126   :  { %v1785_v30 = vpop.eup %1784 }
 0x127   :  { %v1787_v17 = vpop.eup %1786  ;;  %v228_v31 = vadd.f32 1.0, %v1785_v30 }
 0x128   :  { %v1789_v19 = vpop.eup %1788  ;;  %v226_v33 = vadd.f32 1.0, %v1787_v17 }
 0x129   :  { %v1791_v21 = vpop.eup %1790  ;;  %1800 = vrcp.f32 %v228_v31  ;;  %v229_v35 = vadd.f32 1.0, %v1789_v19 }
 0x12a   :  { %1802 = vrcp.f32 %v226_v33  ;;  %v227_v32 = vadd.f32 1.0, %v1791_v21  ;;  %v1793_v36 = vpop.eup %1792 }
 0x12b   :  { %1804 = vrcp.f32 %v229_v35  ;;  %v1795_v34 = vpop.eup %1794  ;;  %v230_v45 = vadd.f32 1.0, %v1793_v36 }
 0x12c   :  { %1806 = vrcp.f32 %v227_v32  ;;  %v1797_v37 = vpop.eup %1796  ;;  %v232_v38 = vadd.f32 1.0, %v1795_v34 }
 0x12d   :  { %1808 = vrcp.f32 %v230_v45  ;;  %v231_v39 = vadd.f32 1.0, %v1797_v37  ;;  %v1799_v40 = vpop.eup %1798 }
 0x12e   :  { %1810 = vrcp.f32 %v232_v38  ;;  %v233_v44 = vadd.f32 1.0, %v1799_v40 }
 0x12f   :  { %1812 = vrcp.f32 %v231_v39 }
 0x130   :  { %1814 = vrcp.f32 %v233_v44 }
 0x136   :  { %v2277_v41 = vpop.eup %1800 }
 0x137   :  { %v2280_v46 = vpop.eup %1802  ;;  %v260_v7 = vmul.f32 0.0, %v2277_v41 }
 0x138   :  { %v2284_v49 = vpop.eup %1804  ;;  %v258_v11 = vmul.f32 0.0, %v2280_v46 }
 0x139   :  { %v2287_v50 = vpop.eup %1806  ;;  %v261_v16 = vmul.f32 0.0, %v2284_v49 }
 0x13a   :  { %v2293_v56 = vpop.eup %1808  ;;  %v259_v18 = vmul.f32 0.0, %v2287_v50 }
 0x13b   :  { %v2296_v60 = vpop.eup %1810  ;;  %v262_v27 = vmul.f32 0.0, %v2293_v56 }
 0x13c   :  { %v2299_v61 = vpop.eup %1812  ;;  %v264_v19 = vmul.f32 0.0, %v2296_v60 }
 0x13d   :  { %v2305_v2 = vpop.eup %1814  ;;  %v263_v35 = vmul.f32 0.0, %v2299_v61 }
 0x17b   :  { %v279_v42 = vpop.permute.xlu0 %278 }
 0x17c   :  { %v300_v43 = vmul.f32 %v2277_v41, %v279_v42  ;;  %v265_v42 = vmul.f32 0.0, %v2305_v2 }
 0x17d   :  { %v275_v47 = vpop.permute.xlu1 %274 }
 0x17e   :  { %v298_v48 = vmul.f32 %v2280_v46, %v275_v47  ;;  %318 = vrot.lane.b32.xlu1 %v300_v43, %s2050_s3 }
 0x180   :  { %314 = vrot.lane.b32.xlu0 %v298_v48, %s2050_s3 }
 0x181   :  { %v277_v51 = vpop.permute.xlu0 %276  ;;  %v281_v53 = vpop.permute.xlu1 %280 }
 0x182   :  { %v299_v54 = vmul.f32 %v2287_v50, %v277_v51  ;;  %v301_v55 = vmul.f32 %v2284_v49, %v281_v53 }
 0x184   :  { %320 = vrot.lane.b32.xlu1 %v301_v55, %s2050_s3  ;;  %316 = vrot.lane.b32.xlu0 %v299_v54, %s2050_s3 }
 0x185   :  { %v283_v57 = vpop.permute.xlu0 %282 }
 0x186   :  { %v302_v59 = vmul.f32 %v2293_v56, %v283_v57 }
 0x188   :  { %322 = vrot.lane.b32.xlu0 %v302_v59, %s2050_s3 }
 0x189   :  { %v287_v62 = vpop.permute.xlu0 %286  ;;  %v285_v63 = vpop.permute.xlu1 %284 }
 0x18a   :  { %v304_v0 = vmul.f32 %v2296_v60, %v287_v62  ;;  %v303_v1 = vmul.f32 %v2299_v61, %v285_v63  ;;  %v2330_v62 = vld [vmem:[#allocation6 + $0x34] ss:$8 sps:$4 sm:$0xff]   ;;  %v2332_v63 = vld [vmem:[#allocation6 + $0x30] ss:$8 sps:$4 sm:$0xff]  }
 0x18b   :  { %481 = vmatprep.subr.bf16.mxu0 %v2330_v62  ;;  %750 = vmatprep.subr.bf16.mxu1 %v2330_v62 }
 0x18c   :  { %324 = vrot.lane.b32.xlu1 %v303_v1, %s2050_s3  ;;  %326 = vrot.lane.b32.xlu0 %v304_v0, %s2050_s3  ;;  %v2334_v0 = vld [vmem:[#allocation6 + $0x24] ss:$8 sps:$4 sm:$0xff]  }
 0x18d   :  { %v289_v4 = vpop.permute.xlu1 %288  ;;  %482 = vmatpush1.bf16.msra.mxu0 %v2332_v63  ;;  %751 = vmatpush1.bf16.msra.mxu1 %v2332_v63 }
 0x18e   :  { %v305_v5 = vmul.f32 %v2305_v2, %v289_v4  ;;  %v2340_v4 = vld [vmem:[#allocation6 + $0x20] ss:$8 sps:$4 sm:$0xff]   ;;  %483 = vmatprep.subr.bf16.mxu0 %v2334_v0  ;;  %752 = vmatprep.subr.bf16.mxu1 %v2334_v0 }
 0x190   :  { %328 = vrot.lane.b32.xlu1 %v305_v5, %s2050_s3 }
 0x191   :  { %484 = vmatpush1.bf16.msra.mxu0 %v2340_v4  ;;  %753 = vmatpush1.bf16.msra.mxu1 %v2340_v4 }
 0x1f0   :  { %v319_v9 = vpop.permute.xlu1 %318 }
 0x1f1   :  { %v340_v10 = vadd.f32 %v319_v9, %v260_v7  ;;  %v2345_v7 = vld [vmem:[#allocation6 + $0x14] ss:$8 sps:$4 sm:$0xff]  }
 0x1f2   :  { %v315_v12 = vpop.permute.xlu0 %314  ;;  %485 = vmatprep.subr.bf16.mxu0 %v2345_v7  ;;  %754 = vmatprep.subr.bf16.mxu1 %v2345_v7 }
 0x1f3   :  { %1816 = vtanh.f32 %v340_v10  ;;  %v338_v14 = vadd.f32 %v315_v12, %v258_v11  ;;  %v549_v28 = vrot.slane %v340_v10, 6  ;;  %v2350_v10 = vld [vmem:[#allocation6 + $0x10] ss:$8 sps:$4 sm:$0xff]   ;;  %v2355_v11 = vld [vmem:[#allocation6 + $0x4] ss:$8 sps:$4 sm:$0xff]  }
 0x1f4   :  { %486 = vmatpush1.bf16.msra.mxu0 %v2350_v10  ;;  %v2359_v12 = vld [vmem:[#allocation6] ss:$8 sps:$4 sm:$0xff]   ;;  %755 = vmatpush1.bf16.msra.mxu1 %v2350_v10 }
 0x1f5   :  { %1818 = vtanh.f32 %v338_v14  ;;  %487 = vmatprep.subr.bf16.mxu0 %v2355_v11  ;;  %756 = vmatprep.subr.bf16.mxu1 %v2355_v11 }
 0x1f6   :  { %v321_v20 = vpop.permute.xlu1 %320  ;;  %v317_v23 = vpop.permute.xlu0 %316 }
 0x1f7   :  { %v341_v24 = vadd.f32 %v321_v20, %v261_v16  ;;  %v339_v25 = vadd.f32 %v317_v23, %v259_v18 }
 0x1f8   :  { %488 = vmatpush1.bf16.msra.mxu0 %v2359_v12  ;;  %757 = vmatpush1.bf16.msra.mxu1 %v2359_v12 }
 0x1f9   :  { %1820 = vtanh.f32 %v341_v24  ;;  %v547_v26 = vrot.slane %v339_v25, 7  ;;  %v551_v30 = vrot.slane %v341_v24, 5  ;;  %631 = vmatprep.subr.bf16.mxu0 %v2330_v62  ;;  %988 = vmatprep.subr.bf16.mxu1 %v2330_v62 }
 0x1fa   :  { %1822 = vtanh.f32 %v339_v25  ;;  %v323_v29 = vpop.permute.xlu0 %322 }
 0x1fb   :  { %v548_v15 = vsel %vm403_vm1, %v547_v26, %v338_v14  ;;  %v342_v17 = vadd.f32 %v323_v29, %v262_v27 }
 0x1fc   :  { %v550_v31 = vsel %vm406_vm2, %v549_v28, %v548_v15 }
 0x1fd   :  { %1824 = vtanh.f32 %v342_v17  ;;  %v552_v33 = vsel %vm409_vm3, %v551_v30, %v550_v31  ;;  %v553_v21 = vrot.slane %v342_v17, 4 }
 0x1fe   :  { %v325_v32 = vpop.permute.xlu1 %324  ;;  %v327_v36 = vpop.permute.xlu0 %326 }
 0x1ff   :  { %v554_v34 = vsel %vm412_vm4, %v553_v21, %v552_v33  ;;  %v343_v45 = vadd.f32 %v325_v32, %v263_v35  ;;  %v344_v37 = vadd.f32 %v327_v36, %v264_v19  ;;  %v2051_v19 = vmov 0  }
 0x200   :  { %v1817_v38 = vpop.eup %1816  ;;  %505 = vmatprep.mubr.bf16.mxu0 %v2051_v19  ;;  %774 = vmatprep.mubr.bf16.mxu1 %v2051_v19 }
 0x201   :  { %1826 = vtanh.f32 %v343_v45  ;;  %v555_v39 = vrot.slane %v343_v45, 3  ;;  %v557_v40 = vrot.slane %v344_v37, 2  ;;  %366 = vrot.lane.b32.xlu1 %v1817_v38, %s2043_s27 }
 0x202   :  { %v1819_v43 = vpop.eup %1818  ;;  %1828 = vtanh.f32 %v344_v37  ;;  %v329_v44 = vpop.permute.xlu1 %328 }
 0x203   :  { %v556_v47 = vsel %vm415_vm5, %v555_v39, %v554_v34  ;;  %v345_v48 = vadd.f32 %v329_v44, %v265_v42  ;;  %362 = vrot.lane.b32.xlu0 %v1819_v43, %s2043_s27  ;;  %v2400_v42 = vld [vmem:[%s2580_s4] ss:$0 sm:$0xff]  ;;  %s2052_s4 = smov 96  }
 0x204   :  { %v558_v51 = vsel %vm418_vm6, %v557_v40, %v556_v47 }
 0x205   :  { %1830 = vtanh.f32 %v345_v48  ;;  %v559_v53 = vrot.slane %v345_v48, 1 }
 0x206   :  { %v1821_v54 = vpop.eup %1820 }
 0x207   :  { %v1823_v55 = vpop.eup %1822  ;;  %368 = vrot.lane.b32.xlu1 %v1821_v54, %s2043_s27  ;;  %v2327_v57 = vsel %vm421_vm7, %v559_v53, %v558_v51 }
 0x208   :  { %364 = vrot.lane.b32.xlu0 %v1823_v55, %s2043_s27 }
 0x20a   :  { %v1825_v59 = vpop.eup %1824 }
 0x20c   :  { %370 = vrot.lane.b32.xlu0 %v1825_v59, %s2043_s27 }
 0x20e   :  { %v1827_v1 = vpop.eup %1826 }
 0x20f   :  { %v1829_v5 = vpop.eup %1828  ;;  %372 = vrot.lane.b32.xlu1 %v1827_v1, %s2043_s27 }
 0x210   :  { %374 = vrot.lane.b32.xlu0 %v1829_v5, %s2043_s27 }
 0x212   :  { %v1831_v9 = vpop.eup %1830 }
 0x213   :  { %376 = vrot.lane.b32.xlu1 %v1831_v9, %s2043_s27 }
 0x273   :  { %v367_v14 = vpop.permute.xlu1 %366 }
 0x274   :  { %v388_v20 = vmul.f32 %v2277_v41, %v367_v14 }
 0x275   :  { %v363_v16 = vpop.permute.xlu0 %362 }
 0x276   :  { %v386_v26 = vmul.f32 %v2280_v46, %v363_v16  ;;  %v405_v28 = vrot.slane %v388_v20, 6 }
 0x279   :  { %v369_v18 = vpop.permute.xlu1 %368 }
 0x27a   :  { %v365_v23 = vpop.permute.xlu0 %364  ;;  %v389_v25 = vmul.f32 %v2284_v49, %v369_v18 }
 0x27b   :  { %v387_v24 = vmul.f32 %v2287_v50, %v365_v23 }
 0x27c   :  { %v408_v17 = vrot.slane %v389_v25, 5 }
 0x27d   :  { %v402_v27 = vrot.slane %v387_v24, 7 }
 0x27e   :  { %v371_v29 = vpop.permute.xlu0 %370 }
 0x27f   :  { %v404_v30 = vsel %vm403_vm1, %v402_v27, %v386_v26  ;;  %v390_v15 = vmul.f32 %v2293_v56, %v371_v29 }
 0x280   :  { %v407_v31 = vsel %vm406_vm2, %v405_v28, %v404_v30 }
 0x281   :  { %v411_v41 = vrot.slane %v390_v15, 4  ;;  %v373_v50 = vpop.permute.xlu1 %372  ;;  %v410_v49 = vsel %vm409_vm3, %v408_v17, %v407_v31 }
 0x282   :  { %v391_v46 = vmul.f32 %v2299_v61, %v373_v50  ;;  %v375_v33 = vpop.permute.xlu0 %374 }
 0x283   :  { %v392_v21 = vmul.f32 %v2296_v60, %v375_v33  ;;  %v413_v56 = vsel %vm412_vm4, %v411_v41, %v410_v49 }
 0x284   :  { %v414_v35 = vrot.slane %v391_v46, 3 }
 0x285   :  { %v417_v32 = vrot.slane %v392_v21, 2  ;;  %v377_v36 = vpop.permute.xlu1 %376 }
 0x286   :  { %v416_v34 = vsel %vm415_vm5, %v414_v35, %v413_v56  ;;  %v393_v45 = vmul.f32 %v2305_v2, %v377_v36 }
 0x287   :  { %v419_v38 = vsel %vm418_vm6, %v417_v32, %v416_v34 }
 0x288   :  { %v420_v37 = vrot.slane %v393_v45, 1 }
 0x28a   :  { %v422_v39 = vsel %vm421_vm7, %v420_v37, %v419_v38 }
 0x28b   :  { %423 = vrot.lane.b32.xlu0 %v422_v39, %s2050_s3 }
 0x2fd   :  { %v424_v61 = vpop.permute.xlu0 %423 }
 0x2fe   :  { %v427_v60 = vsel %vm426_vm8, %v424_v61, 0.0 }
 0x2ff   :  { %v428_v40 = vpack.c.bf16 %v427_v60, %v427_v60 }
 0x301   :  { %1641 = vmatmul.mubr.msk.bf16.vlgmr.msra.gmra.mxu0 %vm469_vm9, %v428_v40 }
 0x302   :  { %632 = vmatpush1.bf16.msra.mxu0 %v2332_v63  ;;  %655 = vmatprep.mubr.bf16.mxu0 %v2051_v19 }
 0x303   :  { %633 = vmatprep.subr.bf16.mxu0 %v2334_v0 }
 0x306   :  { %634 = vmatpush1.bf16.msra.mxu0 %v2340_v4 }
 0x307   :  { %635 = vmatprep.subr.bf16.mxu0 %v2345_v7 }
 0x30a   :  { %636 = vmatpush1.bf16.msra.mxu0 %v2350_v10 }
 0x30b   :  { %637 = vmatprep.subr.bf16.mxu0 %v2355_v11 }
 0x30e   :  { %638 = vmatpush1.bf16.msra.mxu0 %v2359_v12 }
 0x30f   :  { %869 = vmatprep.subr.bf16.mxu0 %v2330_v62 }
 0x3c1   :  { %v507_v2 = vpop.f32.mrf.mxu0 }
 0x3c2   :  { %v537_v43 = vadd.f32 %v2182_v3, %v507_v2 }
 0x3c3   :  { %v509_v44 = vpop.f32.mrf.mxu0 }
 0x3c4   :  { %1832 = vtanh.f32 %v537_v43  ;;  %v538_v47 = vadd.f32 %v2400_v42, %v509_v44  ;;  %v1642_v55 = vmul.f32 -1.442695, %v537_v43 }
 0x3c5   :  { %v511_v48 = vpop.f32.mrf.mxu0 }
 0x3c6   :  { %1834 = vtanh.f32 %v538_v47  ;;  %v1643_v59 = vmul.f32 -1.442695, %v538_v47 }
 0x3c7   :  { %v512_v51 = vpop.f32.mrf.mxu0  ;;  %1836 = vpow2.f32 %v1642_v55 }
 0x3c8   :  { %1838 = vpow2.f32 %v1643_v59 }
 0x3d1   :  { %v1833_v53 = vpop.eup %1832 }
 0x3d2   :  { %580 = vrot.lane.b32.xlu1 %v1833_v53, %s2043_s27 }
 0x3d3   :  { %v1835_v54 = vpop.eup %1834 }
 0x3d4   :  { %582 = vrot.lane.b32.xlu0 %v1835_v54, %s2043_s27  ;;  %v1837_v1 = vpop.eup %1836 }
 0x3d5   :  { %v1839_v5 = vpop.eup %1838  ;;  %v568_v3 = vadd.f32 1.0, %v1837_v1 }
 0x3d6   :  { %v569_v9 = vadd.f32 1.0, %v1839_v5 }
 0x3d7   :  { %1840 = vrcp.f32 %v568_v3 }
 0x3d8   :  { %1842 = vrcp.f32 %v569_v9 }
 0x3e4   :  { %v1841_v14 = vpop.eup %1840 }
 0x3e5   :  { %v1843_v20 = vpop.eup %1842  ;;  %v576_v25 = vmul.f32 %v1841_v14, %v2327_v57 }
 0x3e6   :  { %v577_v28 = vmul.f32 0.0, %v1843_v20 }
 0x444   :  { %v581_v16 = vpop.permute.xlu1 %580 }
 0x445   :  { %v586_v18 = vmul.f32 %v1841_v14, %v581_v16 }
 0x446   :  { %v583_v23 = vpop.permute.xlu0 %582 }
 0x447   :  { %590 = vrot.lane.b32.xlu1 %v586_v18, %s2050_s3  ;;  %v587_v24 = vmul.f32 %v1843_v20, %v583_v23 }
 0x449   :  { %592 = vrot.lane.b32.xlu0 %v587_v24, %s2050_s3 }
 0x4b9   :  { %v591_v26 = vpop.permute.xlu1 %590 }
 0x4ba   :  { %v596_v27 = vadd.f32 %v591_v26, %v576_v25 }
 0x4bb   :  { %v593_v29 = vpop.permute.xlu0 %592 }
 0x4bc   :  { %1844 = vtanh.f32 %v596_v27  ;;  %v597_v30 = vadd.f32 %v593_v29, %v577_v28 }
 0x4be   :  { %1846 = vtanh.f32 %v597_v30 }
 0x4c9   :  { %v1845_v15 = vpop.eup %1844 }
 0x4ca   :  { %602 = vrot.lane.b32.xlu1 %v1845_v15, %s2043_s27 }
 0x4cb   :  { %v1847_v17 = vpop.eup %1846 }
 0x4cc   :  { %604 = vrot.lane.b32.xlu0 %v1847_v17, %s2043_s27 }
 0x53c   :  { %v603_v31 = vpop.permute.xlu1 %602 }
 0x53d   :  { %v608_v41 = vmul.f32 %v1841_v14, %v603_v31 }
 0x53e   :  { %v605_v50 = vpop.permute.xlu0 %604 }
 0x53f   :  { %611 = vrot.lane.b32.xlu1 %v608_v41, %s2050_s3  ;;  %v2412_v49 = vmul.f32 %v1843_v20, %v605_v50 }
 0x541   :  { %615 = vrot.lane.b32.xlu0 %v2412_v49, %s2043_s27 }
 0x5b1   :  { %v612_v57 = vpop.permute.xlu1 %611 }
 0x5b3   :  { %v616_v46 = vpop.permute.xlu0 %615 }
 0x5b4   :  { %v618_v33 = vsel %vm426_vm8, %v612_v57, %v616_v46 }
 0x5b5   :  { %v619_v21 = vpack.c.bf16 %v618_v33, %v618_v33 }
 0x5b7   :  { %1644 = vmatmul.mubr.msk.bf16.vlgmr.msra.gmra.mxu0 %vm469_vm9, %v619_v21 }
 0x5b8   :  { %870 = vmatpush1.bf16.msra.mxu0 %v2332_v63  ;;  %893 = vmatprep.mubr.bf16.mxu0 %v2051_v19 }
 0x5b9   :  { %871 = vmatprep.subr.bf16.mxu0 %v2334_v0 }
 0x5bc   :  { %872 = vmatpush1.bf16.msra.mxu0 %v2340_v4 }
 0x5bd   :  { %873 = vmatprep.subr.bf16.mxu0 %v2345_v7 }
 0x5c0   :  { %874 = vmatpush1.bf16.msra.mxu0 %v2350_v10 }
 0x5c1   :  { %875 = vmatprep.subr.bf16.mxu0 %v2355_v11 }
 0x5c4   :  { %876 = vmatpush1.bf16.msra.mxu0 %v2359_v12 }
 0x5c5   :  { %1107 = vmatprep.subr.bf16.mxu0 %v2330_v62 }
 0x677   :  { %v657_v35 = vpop.f32.mrf.mxu0 }
 0x678   :  { %v679_v56 = vadd.f32 %v2188_v8, %v657_v35 }
 0x679   :  { %v659_v32 = vpop.f32.mrf.mxu0 }
 0x67a   :  { %1848 = vtanh.f32 %v679_v56  ;;  %v680_v36 = vadd.f32 %v2400_v42, %v659_v32  ;;  %v1645_v39 = vmul.f32 -1.442695, %v679_v56 }
 0x67b   :  { %v661_v34 = vpop.f32.mrf.mxu0 }
 0x67c   :  { %1850 = vtanh.f32 %v680_v36  ;;  %v1646_v61 = vmul.f32 -1.442695, %v680_v36 }
 0x67d   :  { %v662_v45 = vpop.f32.mrf.mxu0  ;;  %1852 = vpow2.f32 %v1645_v39 }
 0x67e   :  { %1854 = vpow2.f32 %v1646_v61 }
 0x687   :  { %v1849_v37 = vpop.eup %1848 }
 0x688   :  { %699 = vrot.lane.b32.xlu1 %v1849_v37, %s2043_s27 }
 0x689   :  { %v1851_v38 = vpop.eup %1850 }
 0x68a   :  { %701 = vrot.lane.b32.xlu0 %v1851_v38, %s2043_s27  ;;  %v1853_v60 = vpop.eup %1852 }
 0x68b   :  { %v1855_v40 = vpop.eup %1854  ;;  %v687_v8 = vadd.f32 1.0, %v1853_v60 }
 0x68c   :  { %v688_v2 = vadd.f32 1.0, %v1855_v40 }
 0x68d   :  { %1856 = vrcp.f32 %v687_v8 }
 0x68e   :  { %1858 = vrcp.f32 %v688_v2 }
 0x69a   :  { %v1857_v43 = vpop.eup %1856 }
 0x69b   :  { %v1859_v48 = vpop.eup %1858  ;;  %v695_v54 = vmul.f32 %v1857_v43, %v596_v27 }
 0x69c   :  { %v696_v1 = vmul.f32 %v1859_v48, %v597_v30 }
 0x6fa   :  { %v700_v44 = vpop.permute.xlu1 %699 }
 0x6fb   :  { %v705_v47 = vmul.f32 %v1857_v43, %v700_v44 }
 0x6fc   :  { %v702_v51 = vpop.permute.xlu0 %701 }
 0x6fd   :  { %709 = vrot.lane.b32.xlu1 %v705_v47, %s2050_s3  ;;  %v706_v53 = vmul.f32 %v1859_v48, %v702_v51 }
 0x6ff   :  { %711 = vrot.lane.b32.xlu0 %v706_v53, %s2050_s3 }
 0x76f   :  { %v710_v55 = vpop.permute.xlu1 %709 }
 0x770   :  { %v715_v59 = vadd.f32 %v710_v55, %v695_v54 }
 0x771   :  { %v712_v5 = vpop.permute.xlu0 %711 }
 0x772   :  { %1860 = vtanh.f32 %v715_v59  ;;  %v716_v3 = vadd.f32 %v712_v5, %v696_v1 }
 0x774   :  { %1862 = vtanh.f32 %v716_v3 }
 0x77f   :  { %v1861_v9 = vpop.eup %1860 }
 0x780   :  { %721 = vrot.lane.b32.xlu1 %v1861_v9, %s2043_s27 }
 0x781   :  { %v1863_v14 = vpop.eup %1862 }
 0x782   :  { %723 = vrot.lane.b32.xlu0 %v1863_v14, %s2043_s27 }
 0x7f2   :  { %v722_v16 = vpop.permute.xlu1 %721 }
 0x7f3   :  { %v727_v18 = vmul.f32 %v1857_v43, %v722_v16 }
 0x7f4   :  { %v724_v20 = vpop.permute.xlu0 %723 }
 0x7f5   :  { %730 = vrot.lane.b32.xlu1 %v727_v18, %s2050_s3  ;;  %v728_v23 = vmul.f32 %v1859_v48, %v724_v20 }
 0x7f7   :  { %734 = vrot.lane.b32.xlu0 %v728_v23, %s2043_s27 }
 0x867   :  { %v731_v24 = vpop.permute.xlu1 %730 }
 0x869   :  { %v2437_v25 = vpop.permute.xlu0 %734 }
 0x86a   :  { %v737_v26 = vsel %vm426_vm8, %v731_v24, %v2437_v25 }
 0x86b   :  { %v738_v27 = vpack.c.bf16 %v737_v26, %v737_v26 }
 0x86d   :  { %1647 = vmatmul.mubr.msk.bf16.vlgmr.msra.gmra.mxu1 %vm469_vm9, %v738_v27 }
 0x86e   :  { %989 = vmatpush1.bf16.msra.mxu1 %v2332_v63  ;;  %1012 = vmatprep.mubr.bf16.mxu1 %v2051_v19 }
 0x86f   :  { %990 = vmatprep.subr.bf16.mxu1 %v2334_v0 }
 0x872   :  { %991 = vmatpush1.bf16.msra.mxu1 %v2340_v4 }
 0x873   :  { %992 = vmatprep.subr.bf16.mxu1 %v2345_v7 }
 0x876   :  { %993 = vmatpush1.bf16.msra.mxu1 %v2350_v10 }
 0x877   :  { %994 = vmatprep.subr.bf16.mxu1 %v2355_v11 }
 0x87a   :  { %995 = vmatpush1.bf16.msra.mxu1 %v2359_v12 }
 0x87b   :  { %1226 = vmatprep.subr.bf16.mxu1 %v2330_v62 }
 0x92d   :  { %v776_v28 = vpop.f32.mrf.mxu1 }
 0x92e   :  { %v798_v29 = vadd.f32 %v2197_v13, %v776_v28 }
 0x92f   :  { %v778_v30 = vpop.f32.mrf.mxu1 }
 0x930   :  { %1864 = vtanh.f32 %v798_v29  ;;  %v799_v15 = vadd.f32 %v2400_v42, %v778_v30  ;;  %v1648_v57 = vmul.f32 -1.442695, %v798_v29 }
 0x931   :  { %v780_v17 = vpop.f32.mrf.mxu1 }
 0x932   :  { %1866 = vtanh.f32 %v799_v15  ;;  %v1649_v46 = vmul.f32 -1.442695, %v799_v15 }
 0x933   :  { %v781_v31 = vpop.f32.mrf.mxu1  ;;  %1868 = vpow2.f32 %v1648_v57 }
 0x934   :  { %1870 = vpow2.f32 %v1649_v46 }
 0x93d   :  { %v1865_v41 = vpop.eup %1864 }
 0x93e   :  { %818 = vrot.lane.b32.xlu1 %v1865_v41, %s2043_s27 }
 0x93f   :  { %v1867_v50 = vpop.eup %1866 }
 0x940   :  { %820 = vrot.lane.b32.xlu0 %v1867_v50, %s2043_s27  ;;  %v1869_v33 = vpop.eup %1868 }
 0x941   :  { %v1871_v21 = vpop.eup %1870  ;;  %v806_v13 = vadd.f32 1.0, %v1869_v33 }
 0x942   :  { %v807_v35 = vadd.f32 1.0, %v1871_v21 }
 0x943   :  { %1872 = vrcp.f32 %v806_v13 }
 0x944   :  { %1874 = vrcp.f32 %v807_v35 }
 0x950   :  { %v1873_v56 = vpop.eup %1872 }
 0x951   :  { %v1875_v34 = vpop.eup %1874  ;;  %v814_v38 = vmul.f32 %v1873_v56, %v715_v59 }
 0x952   :  { %v815_v60 = vmul.f32 %v1875_v34, %v716_v3 }
 0x9b0   :  { %v819_v32 = vpop.permute.xlu1 %818 }
 0x9b1   :  { %v824_v36 = vmul.f32 %v1873_v56, %v819_v32 }
 0x9b2   :  { %v821_v45 = vpop.permute.xlu0 %820 }
 0x9b3   :  { %828 = vrot.lane.b32.xlu1 %v824_v36, %s2050_s3  ;;  %v825_v37 = vmul.f32 %v1875_v34, %v821_v45 }
 0x9b5   :  { %830 = vrot.lane.b32.xlu0 %v825_v37, %s2050_s3 }
 0xa25   :  { %v829_v39 = vpop.permute.xlu1 %828 }
 0xa26   :  { %v834_v61 = vadd.f32 %v829_v39, %v814_v38 }
 0xa27   :  { %v831_v40 = vpop.permute.xlu0 %830 }
 0xa28   :  { %1876 = vtanh.f32 %v834_v61  ;;  %v835_v8 = vadd.f32 %v831_v40, %v815_v60 }
 0xa2a   :  { %1878 = vtanh.f32 %v835_v8 }
 0xa35   :  { %v1877_v2 = vpop.eup %1876 }
 0xa36   :  { %840 = vrot.lane.b32.xlu1 %v1877_v2, %s2043_s27 }
 0xa37   :  { %v1879_v43 = vpop.eup %1878 }
 0xa38   :  { %842 = vrot.lane.b32.xlu0 %v1879_v43, %s2043_s27 }
 0xaa8   :  { %v841_v44 = vpop.permute.xlu1 %840 }
 0xaa9   :  { %v846_v47 = vmul.f32 %v1873_v56, %v841_v44 }
 0xaaa   :  { %v843_v48 = vpop.permute.xlu0 %842 }
 0xaab   :  { %849 = vrot.lane.b32.xlu1 %v846_v47, %s2050_s3  ;;  %v2460_v51 = vmul.f32 %v1875_v34, %v843_v48 }
 0xaad   :  { %853 = vrot.lane.b32.xlu0 %v2460_v51, %s2043_s27 }
 0xb1d   :  { %v850_v53 = vpop.permute.xlu1 %849 }
 0xb1f   :  { %v854_v54 = vpop.permute.xlu0 %853 }
 0xb20   :  { %v856_v55 = vsel %vm426_vm8, %v850_v53, %v854_v54 }
 0xb21   :  { %v857_v59 = vpack.c.bf16 %v856_v55, %v856_v55 }
 0xb23   :  { %1650 = vmatmul.mubr.msk.bf16.vlgmr.msra.gmra.mxu0 %vm469_vm9, %v857_v59 }
 0xb24   :  { %1108 = vmatpush1.bf16.msra.mxu0 %v2332_v63  ;;  %1131 = vmatprep.mubr.bf16.mxu0 %v2051_v19 }
 0xb25   :  { %1109 = vmatprep.subr.bf16.mxu0 %v2334_v0 }
 0xb28   :  { %1110 = vmatpush1.bf16.msra.mxu0 %v2340_v4 }
 0xb29   :  { %1111 = vmatprep.subr.bf16.mxu0 %v2345_v7 }
 0xb2c   :  { %1112 = vmatpush1.bf16.msra.mxu0 %v2350_v10 }
 0xb2d   :  { %1113 = vmatprep.subr.bf16.mxu0 %v2355_v11 }
 0xb30   :  { %1114 = vmatpush1.bf16.msra.mxu0 %v2359_v12 }
 0xb31   :  { %1345 = vmatprep.subr.bf16.mxu0 %v2330_v62 }
 0xbe3   :  { %v895_v1 = vpop.f32.mrf.mxu0 }
 0xbe4   :  { %v917_v5 = vadd.f32 %v2230_v52, %v895_v1 }
 0xbe5   :  { %v897_v3 = vpop.f32.mrf.mxu0 }
 0xbe6   :  { %1880 = vtanh.f32 %v917_v5  ;;  %v918_v9 = vadd.f32 %v2400_v42, %v897_v3  ;;  %v1651_v23 = vmul.f32 -1.442695, %v917_v5 }
 0xbe7   :  { %v899_v14 = vpop.f32.mrf.mxu0 }
 0xbe8   :  { %1882 = vtanh.f32 %v918_v9  ;;  %v1652_v24 = vmul.f32 -1.442695, %v918_v9 }
 0xbe9   :  { %v900_v16 = vpop.f32.mrf.mxu0  ;;  %1884 = vpow2.f32 %v1651_v23 }
 0xbea   :  { %1886 = vpow2.f32 %v1652_v24 }
 0xbf3   :  { %v1881_v18 = vpop.eup %1880 }
 0xbf4   :  { %937 = vrot.lane.b32.xlu1 %v1881_v18, %s2043_s27 }
 0xbf5   :  { %v1883_v20 = vpop.eup %1882 }
 0xbf6   :  { %939 = vrot.lane.b32.xlu0 %v1883_v20, %s2043_s27  ;;  %v1885_v62 = vpop.eup %1884 }
 0xbf7   :  { %v1887_v26 = vpop.eup %1886  ;;  %v925_v52 = vadd.f32 1.0, %v1885_v62 }
 0xbf8   :  { %v926_v27 = vadd.f32 1.0, %v1887_v26 }
 0xbf9   :  { %1888 = vrcp.f32 %v925_v52 }
 0xbfa   :  { %1890 = vrcp.f32 %v926_v27 }
 0xc06   :  { %v1889_v28 = vpop.eup %1888 }
 0xc07   :  { %v1891_v15 = vpop.eup %1890  ;;  %v933_v41 = vmul.f32 %v1889_v28, %v834_v61 }
 0xc08   :  { %v934_v46 = vmul.f32 %v1891_v15, %v835_v8 }
 0xc66   :  { %v938_v29 = vpop.permute.xlu1 %937 }
 0xc67   :  { %v943_v30 = vmul.f32 %v1889_v28, %v938_v29 }
 0xc68   :  { %v940_v17 = vpop.permute.xlu0 %939 }
 0xc69   :  { %947 = vrot.lane.b32.xlu1 %v943_v30, %s2050_s3  ;;  %v944_v31 = vmul.f32 %v1891_v15, %v940_v17 }
 0xc6b   :  { %949 = vrot.lane.b32.xlu0 %v944_v31, %s2050_s3 }
 0xcdb   :  { %v948_v50 = vpop.permute.xlu1 %947 }
 0xcdc   :  { %v953_v57 = vadd.f32 %v948_v50, %v933_v41 }
 0xcdd   :  { %v950_v33 = vpop.permute.xlu0 %949 }
 0xcde   :  { %1892 = vtanh.f32 %v953_v57  ;;  %v954_v21 = vadd.f32 %v950_v33, %v934_v46 }
 0xce0   :  { %1894 = vtanh.f32 %v954_v21 }
 0xceb   :  { %v1893_v13 = vpop.eup %1892 }
 0xcec   :  { %959 = vrot.lane.b32.xlu1 %v1893_v13, %s2043_s27 }
 0xced   :  { %v1895_v35 = vpop.eup %1894 }
 0xcee   :  { %961 = vrot.lane.b32.xlu0 %v1895_v35, %s2043_s27 }
 0xd5e   :  { %v960_v56 = vpop.permute.xlu1 %959 }
 0xd5f   :  { %v965_v32 = vmul.f32 %v1889_v28, %v960_v56 }
 0xd60   :  { %v962_v36 = vpop.permute.xlu0 %961 }
 0xd61   :  { %968 = vrot.lane.b32.xlu1 %v965_v32, %s2050_s3  ;;  %v2484_v34 = vmul.f32 %v1891_v15, %v962_v36 }
 0xd63   :  { %972 = vrot.lane.b32.xlu0 %v2484_v34, %s2043_s27 }
 0xdd3   :  { %v969_v45 = vpop.permute.xlu1 %968 }
 0xdd5   :  { %v973_v37 = vpop.permute.xlu0 %972 }
 0xdd6   :  { %v975_v38 = vsel %vm426_vm8, %v969_v45, %v973_v37 }
 0xdd7   :  { %v976_v39 = vpack.c.bf16 %v975_v38, %v975_v38 }
 0xdd9   :  { %1653 = vmatmul.mubr.msk.bf16.vlgmr.msra.gmra.mxu1 %vm469_vm9, %v976_v39 }
 0xdda   :  { %1227 = vmatpush1.bf16.msra.mxu1 %v2332_v63  ;;  %1250 = vmatprep.mubr.bf16.mxu1 %v2051_v19 }
 0xddb   :  { %1228 = vmatprep.subr.bf16.mxu1 %v2334_v0 }
 0xdde   :  { %1229 = vmatpush1.bf16.msra.mxu1 %v2340_v4 }
 0xddf   :  { %1230 = vmatprep.subr.bf16.mxu1 %v2345_v7 }
 0xde2   :  { %1231 = vmatpush1.bf16.msra.mxu1 %v2350_v10 }
 0xde3   :  { %1232 = vmatprep.subr.bf16.mxu1 %v2355_v11 }
 0xde6   :  { %1233 = vmatpush1.bf16.msra.mxu1 %v2359_v12 }
 0xe99   :  { %v1014_v61 = vpop.f32.mrf.mxu1 }
 0xe9a   :  { %v1036_v60 = vadd.f32 %v2239_v58, %v1014_v61 }
 0xe9b   :  { %v1016_v40 = vpop.f32.mrf.mxu1 }
 0xe9c   :  { %1896 = vtanh.f32 %v1036_v60  ;;  %v1037_v8 = vadd.f32 %v2400_v42, %v1016_v40  ;;  %v1654_v48 = vmul.f32 -1.442695, %v1036_v60 }
 0xe9d   :  { %v1018_v2 = vpop.f32.mrf.mxu1 }
 0xe9e   :  { %1898 = vtanh.f32 %v1037_v8  ;;  %v1655_v53 = vmul.f32 -1.442695, %v1037_v8 }
 0xe9f   :  { %v1019_v43 = vpop.f32.mrf.mxu1  ;;  %1900 = vpow2.f32 %v1654_v48 }
 0xea0   :  { %1902 = vpow2.f32 %v1655_v53 }
 0xea9   :  { %v1897_v44 = vpop.eup %1896 }
 0xeaa   :  { %1056 = vrot.lane.b32.xlu1 %v1897_v44, %s2043_s27 }
 0xeab   :  { %v1899_v47 = vpop.eup %1898 }
 0xeac   :  { %1058 = vrot.lane.b32.xlu0 %v1899_v47, %s2043_s27  ;;  %v1901_v54 = vpop.eup %1900 }
 0xead   :  { %v1903_v55 = vpop.eup %1902  ;;  %v1044_v58 = vadd.f32 1.0, %v1901_v54 }
 0xeae   :  { %v1045_v59 = vadd.f32 1.0, %v1903_v55 }
 0xeaf   :  { %1904 = vrcp.f32 %v1044_v58 }
 0xeb0   :  { %1906 = vrcp.f32 %v1045_v59 }
 0xebc   :  { %v1905_v1 = vpop.eup %1904 }
 0xebd   :  { %v1907_v9 = vpop.eup %1906  ;;  %v1052_v18 = vmul.f32 %v1905_v1, %v953_v57 }
 0xebe   :  { %v1053_v24 = vmul.f32 %v1907_v9, %v954_v21 }
 0xf1c   :  { %v1057_v5 = vpop.permute.xlu1 %1056 }
 0xf1d   :  { %v1062_v3 = vmul.f32 %v1905_v1, %v1057_v5 }
 0xf1e   :  { %v1059_v14 = vpop.permute.xlu0 %1058 }
 0xf1f   :  { %1066 = vrot.lane.b32.xlu1 %v1062_v3, %s2050_s3  ;;  %v1063_v16 = vmul.f32 %v1907_v9, %v1059_v14 }
 0xf21   :  { %1068 = vrot.lane.b32.xlu0 %v1063_v16, %s2050_s3 }
 0xf91   :  { %v1067_v20 = vpop.permute.xlu1 %1066 }
 0xf92   :  { %v1072_v23 = vadd.f32 %v1067_v20, %v1052_v18 }
 0xf93   :  { %v1069_v62 = vpop.permute.xlu0 %1068 }
 0xf94   :  { %1908 = vtanh.f32 %v1072_v23  ;;  %v1073_v26 = vadd.f32 %v1069_v62, %v1053_v24 }
 0xf96   :  { %1910 = vtanh.f32 %v1073_v26 }
 0xfa1   :  { %v1909_v52 = vpop.eup %1908 }
 0xfa2   :  { %1078 = vrot.lane.b32.xlu1 %v1909_v52, %s2043_s27 }
 0xfa3   :  { %v1911_v27 = vpop.eup %1910 }
 0xfa4   :  { %1080 = vrot.lane.b32.xlu0 %v1911_v27, %s2043_s27 }
0x1014   :  { %v1079_v28 = vpop.permute.xlu1 %1078 }
0x1015   :  { %v1084_v29 = vmul.f32 %v1905_v1, %v1079_v28 }
0x1016   :  { %v1081_v30 = vpop.permute.xlu0 %1080 }
0x1017   :  { %1087 = vrot.lane.b32.xlu1 %v1084_v29, %s2050_s3  ;;  %v2507_v15 = vmul.f32 %v1907_v9, %v1081_v30 }
0x1019   :  { %1091 = vrot.lane.b32.xlu0 %v2507_v15, %s2043_s27 }
0x1089   :  { %v1088_v17 = vpop.permute.xlu1 %1087 }
0x108b   :  { %v1092_v31 = vpop.permute.xlu0 %1091 }
0x108c   :  { %v1094_v41 = vsel %vm426_vm8, %v1088_v17, %v1092_v31 }
0x108d   :  { %v1095_v50 = vpack.c.bf16 %v1094_v41, %v1094_v41 }
0x108f   :  { %1656 = vmatmul.mubr.msk.bf16.vlgmr.msra.gmra.mxu0 %vm469_vm9, %v1095_v50 }
0x1090   :  { %1346 = vmatpush1.bf16.msra.mxu0 %v2332_v63  ;;  %1369 = vmatprep.mubr.bf16.mxu0 %v2051_v19 }
0x1091   :  { %1347 = vmatprep.subr.bf16.mxu0 %v2334_v0 }
0x1094   :  { %1348 = vmatpush1.bf16.msra.mxu0 %v2340_v4 }
0x1095   :  { %1349 = vmatprep.subr.bf16.mxu0 %v2345_v7 }
0x1098   :  { %1350 = vmatpush1.bf16.msra.mxu0 %v2350_v10 }
0x1099   :  { %1351 = vmatprep.subr.bf16.mxu0 %v2355_v11 }
0x109c   :  { %1352 = vmatpush1.bf16.msra.mxu0 %v2359_v12 }
0x114f   :  { %v1133_v57 = vpop.f32.mrf.mxu0 }
0x1150   :  { %v1155_v46 = vadd.f32 %v2254_v6, %v1133_v57 }
0x1151   :  { %v1135_v33 = vpop.f32.mrf.mxu0 }
0x1152   :  { %1912 = vtanh.f32 %v1155_v46  ;;  %v1156_v63 = vadd.f32 %v2400_v42, %v1135_v33  ;;  %v1657_v7 = vmul.f32 -1.442695, %v1155_v46 }
0x1153   :  { %v1137_v19 = vpop.f32.mrf.mxu0 }
0x1154   :  { %1914 = vtanh.f32 %v1156_v63  ;;  %v1658_v10 = vmul.f32 -1.442695, %v1156_v63 }
0x1155   :  { %v1138_v0 = vpop.f32.mrf.mxu0  ;;  %1916 = vpow2.f32 %v1657_v7 }
0x1156   :  { %1918 = vpow2.f32 %v1658_v10 }
0x115f   :  { %v1913_v21 = vpop.eup %1912 }
0x1160   :  { %1175 = vrot.lane.b32.xlu1 %v1913_v21, %s2043_s27 }
0x1161   :  { %v1915_v4 = vpop.eup %1914 }
0x1162   :  { %1177 = vrot.lane.b32.xlu0 %v1915_v4, %s2043_s27  ;;  %v1917_v11 = vpop.eup %1916 }
0x1163   :  { %v1919_v12 = vpop.eup %1918  ;;  %v1163_v6 = vadd.f32 1.0, %v1917_v11 }
0x1164   :  { %v1164_v13 = vadd.f32 1.0, %v1919_v12 }
0x1165   :  { %1920 = vrcp.f32 %v1163_v6 }
0x1166   :  { %1922 = vrcp.f32 %v1164_v13 }
0x1172   :  { %v1921_v35 = vpop.eup %1920 }
0x1173   :  { %v1923_v36 = vpop.eup %1922  ;;  %v1171_v38 = vmul.f32 %v1921_v35, %v1072_v23 }
0x1174   :  { %v1172_v60 = vmul.f32 %v1923_v36, %v1073_v26 }
0x11d2   :  { %v1176_v56 = vpop.permute.xlu1 %1175 }
0x11d3   :  { %v1181_v32 = vmul.f32 %v1921_v35, %v1176_v56 }
0x11d4   :  { %v1178_v45 = vpop.permute.xlu0 %1177 }
0x11d5   :  { %1185 = vrot.lane.b32.xlu1 %v1181_v32, %s2050_s3  ;;  %v1182_v37 = vmul.f32 %v1923_v36, %v1178_v45 }
0x11d7   :  { %1187 = vrot.lane.b32.xlu0 %v1182_v37, %s2050_s3 }
0x1247   :  { %v1186_v39 = vpop.permute.xlu1 %1185 }
0x1248   :  { %v1191_v61 = vadd.f32 %v1186_v39, %v1171_v38 }
0x1249   :  { %v1188_v40 = vpop.permute.xlu0 %1187 }
0x124a   :  { %1924 = vtanh.f32 %v1191_v61  ;;  %v1192_v8 = vadd.f32 %v1188_v40, %v1172_v60 }
0x124c   :  { %1926 = vtanh.f32 %v1192_v8 }
0x1257   :  { %v1925_v2 = vpop.eup %1924 }
0x1258   :  { %1197 = vrot.lane.b32.xlu1 %v1925_v2, %s2043_s27  ;;  %v1729_v2 = vpack.i.bf16 %v2412_v49, %v2507_v15  ;;  %v1761_v49 = vld [vmem:[#allocation7 + $0x18] sm:$0xff]   ;;  %v1762_v15 = vld [vmem:[#allocation7 + $0x50] sm:$0xff]  }
0x1259   :  { %v1927_v43 = vpop.eup %1926 }
0x125a   :  { %1199 = vrot.lane.b32.xlu0 %v1927_v43, %s2043_s27  ;;  %v1753_v43 = vld [vmem:[#allocation7 + $0x38] sm:$0xff]  }
0x12ca   :  { %v1198_v44 = vpop.permute.xlu1 %1197 }
0x12cb   :  { %v1203_v47 = vmul.f32 %v1921_v35, %v1198_v44  ;;  %v1754_v44 = vld [vmem:[#allocation7 + $0x70] sm:$0xff]  }
0x12cc   :  { %v1200_v48 = vpop.permute.xlu0 %1199 }
0x12cd   :  { %1206 = vrot.lane.b32.xlu1 %v1203_v47, %s2050_s3  ;;  %v1204_v53 = vmul.f32 %v1923_v36, %v1200_v48  ;;  %v1755_v47 = vld [vmem:[#allocation7 + $0x30] sm:$0xff]   ;;  %v1756_v48 = vld [vmem:[#allocation7 + $0x68] sm:$0xff]  }
0x12cf   :  { %1210 = vrot.lane.b32.xlu0 %v1204_v53, %s2043_s27  ;;  %v1757_v53 = vld [vmem:[#allocation7 + $0x28] sm:$0xff]  }
0x133f   :  { %v1207_v54 = vpop.permute.xlu1 %1206 }
0x1341   :  { %v2531_v55 = vpop.permute.xlu0 %1210 }
0x1342   :  { %v1213_v58 = vsel %vm426_vm8, %v1207_v54, %v2531_v55  ;;  %v1758_v54 = vld [vmem:[#allocation7 + $0x60] sm:$0xff]  }
0x1343   :  { %v1214_v59 = vpack.c.bf16 %v1213_v58, %v1213_v58  ;;  %v1759_v58 = vld [vmem:[#allocation7 + $0x20] sm:$0xff]  }
0x1345   :  { %1659 = vmatmul.mubr.msk.bf16.vlgmr.msra.gmra.mxu1 %vm469_vm9, %v1214_v59  ;;  %v1760_v59 = vld [vmem:[#allocation7 + $0x58] sm:$0xff]  }
0x1405   :  { %v1252_v1 = vpop.f32.mrf.mxu1 }
0x1406   :  { %v1274_v5 = vadd.f32 %v2267_v22, %v1252_v1 }
0x1407   :  { %v1254_v3 = vpop.f32.mrf.mxu1 }
0x1408   :  { %1928 = vtanh.f32 %v1274_v5  ;;  %v1275_v9 = vadd.f32 %v2400_v42, %v1254_v3  ;;  %v1660_v23 = vmul.f32 -1.442695, %v1274_v5 }
0x1409   :  { %v1256_v14 = vpop.f32.mrf.mxu1 }
0x140a   :  { %1930 = vtanh.f32 %v1275_v9  ;;  %v1661_v24 = vmul.f32 -1.442695, %v1275_v9  ;;  %v1763_v9 = vld [vmem:[#allocation7 + $0x10] sm:$0xff]   ;;  %v1764_v14 = vld [vmem:[#allocation7 + $0x48] sm:$0xff]  }
0x140b   :  { %v1257_v16 = vpop.f32.mrf.mxu1  ;;  %1932 = vpow2.f32 %v1660_v23 }
0x140c   :  { %1934 = vpow2.f32 %v1661_v24  ;;  %v1765_v16 = vld [vmem:[#allocation7 + $0x8] sm:$0xff]  }
0x1415   :  { %v1929_v18 = vpop.eup %1928 }
0x1416   :  { %1294 = vrot.lane.b32.xlu1 %v1929_v18, %s2043_s27  ;;  %v1766_v18 = vld [vmem:[#allocation7 + $0x40] sm:$0xff]  }
0x1417   :  { %v1931_v20 = vpop.eup %1930 }
0x1418   :  { %1296 = vrot.lane.b32.xlu0 %v1931_v20, %s2043_s27  ;;  %v1933_v62 = vpop.eup %1932  ;;  %v1767_v20 = vld [vmem:[#allocation7] sm:$0xff]  }
0x1419   :  { %v1935_v26 = vpop.eup %1934  ;;  %v1282_v22 = vadd.f32 1.0, %v1933_v62 }
0x141a   :  { %v1283_v52 = vadd.f32 1.0, %v1935_v26 }
0x141b   :  { %1936 = vrcp.f32 %v1282_v22 }
0x141c   :  { %1938 = vrcp.f32 %v1283_v52 }
0x1428   :  { %v1937_v27 = vpop.eup %1936 }
0x1429   :  { %v1939_v30 = vpop.eup %1938  ;;  %v1290_v41 = vmul.f32 %v1937_v27, %v1191_v61 }
0x142a   :  { %v1291_v46 = vmul.f32 %v1939_v30, %v1192_v8 }
0x1488   :  { %v1295_v28 = vpop.permute.xlu1 %1294 }
0x1489   :  { %v1300_v29 = vmul.f32 %v1937_v27, %v1295_v28 }
0x148a   :  { %v1297_v17 = vpop.permute.xlu0 %1296 }
0x148b   :  { %1304 = vrot.lane.b32.xlu1 %v1300_v29, %s2050_s3  ;;  %v1301_v31 = vmul.f32 %v1939_v30, %v1297_v17 }
0x148d   :  { %1306 = vrot.lane.b32.xlu0 %v1301_v31, %s2050_s3 }
0x14fd   :  { %v1305_v50 = vpop.permute.xlu1 %1304 }
0x14fe   :  { %v1310_v57 = vadd.f32 %v1305_v50, %v1290_v41 }
0x14ff   :  { %v1307_v33 = vpop.permute.xlu0 %1306 }
0x1500   :  { %1940 = vtanh.f32 %v1310_v57  ;;  %v1311_v63 = vadd.f32 %v1307_v33, %v1291_v46 }
0x1502   :  { %1942 = vtanh.f32 %v1311_v63 }
0x150d   :  { %v1941_v19 = vpop.eup %1940 }
0x150e   :  { %1316 = vrot.lane.b32.xlu1 %v1941_v19, %s2043_s27 }
0x150f   :  { %v1943_v0 = vpop.eup %1942 }
0x1510   :  { %1318 = vrot.lane.b32.xlu0 %v1943_v0, %s2043_s27 }
0x1580   :  { %v1317_v21 = vpop.permute.xlu1 %1316 }
0x1581   :  { %v1322_v4 = vmul.f32 %v1937_v27, %v1317_v21 }
0x1582   :  { %v1319_v7 = vpop.permute.xlu0 %1318 }
0x1583   :  { %1325 = vrot.lane.b32.xlu1 %v1322_v4, %s2050_s3  ;;  %v2545_v10 = vmul.f32 %v1939_v30, %v1319_v7 }
0x1585   :  { %1329 = vrot.lane.b32.xlu0 %v2545_v10, %s2043_s27  ;;  %v1734_v24 = vpack.i.bf16 %v2460_v51, %v2545_v10 }
0x15f5   :  { %v1326_v11 = vpop.permute.xlu1 %1325 }
0x15f7   :  { %v1330_v12 = vpop.permute.xlu0 %1329 }
0x15f8   :  { %v1332_v6 = vsel %vm426_vm8, %v1326_v11, %v1330_v12 }
0x15f9   :  { %v1333_v13 = vpack.c.bf16 %v1332_v6, %v1332_v6 }
0x15fb   :  { %1662 = vmatmul.mubr.msk.bf16.vlgmr.msra.gmra.mxu0 %vm469_vm9, %v1333_v13 }
0x16bb   :  { %v1371_v35 = vpop.f32.mrf.mxu0 }
0x16bd   :  { %v1372_v56 = vpop.f32.mrf.mxu0 }
0x16be   :  { %v1377_v32 = vadd.f32 %v2400_v42, %v1372_v56  ;;  %v1752_v42 = vld [vmem:[#allocation7 + $0x78] sm:$0xff]  }
0x16bf   :  { %v1374_v36 = vpop.f32.mrf.mxu0  ;;  %1686 = vmatprep.subr.bf16.mxu1 %v1752_v42 }
0x16c0   :  { %1944 = vtanh.f32 %v1377_v32  ;;  %v1663_v38 = vmul.f32 -1.442695, %v1377_v32  ;;  %1687 = vmatpush3.bf16.msra.mxu1 %v1753_v43 }
0x16c1   :  { %v1375_v45 = vpop.f32.mrf.mxu0  ;;  %1688 = vmatprep.subr.bf16.mxu1 %v1754_v44 }
0x16c2   :  { %1946 = vpow2.f32 %v1663_v38 }
0x16c4   :  { %1689 = vmatpush3.bf16.msra.mxu1 %v1755_v47 }
0x16c5   :  { %1690 = vmatprep.subr.bf16.mxu1 %v1756_v48 }
0x16c8   :  { %1691 = vmatpush3.bf16.msra.mxu1 %v1757_v53 }
0x16c9   :  { %1692 = vmatprep.subr.bf16.mxu1 %v1758_v54 }
0x16cc   :  { %1693 = vmatpush3.bf16.msra.mxu1 %v1759_v58 }
0x16cd   :  { %v1945_v37 = vpop.eup %1944  ;;  %1694 = vmatprep.subr.bf16.mxu1 %v1760_v59 }
0x16ce   :  { %1387 = vrot.lane.b32.xlu1 %v1945_v37, %s2043_s27 }
0x16cf   :  { %v1947_v39 = vpop.eup %1946 }
0x16d0   :  { %v1381_v61 = vadd.f32 1.0, %v1947_v39  ;;  %1695 = vmatpush3.bf16.msra.mxu1 %v1761_v49 }
0x16d1   :  { %1696 = vmatprep.subr.bf16.mxu1 %v1762_v15 }
0x16d2   :  { %1948 = vrcp.f32 %v1381_v61 }
0x16d4   :  { %1697 = vmatpush3.bf16.msra.mxu1 %v1763_v9 }
0x16d5   :  { %1698 = vmatprep.subr.bf16.mxu1 %v1764_v14 }
0x16d8   :  { %1699 = vmatpush3.bf16.msra.mxu1 %v1765_v16 }
0x16d9   :  { %1700 = vmatprep.subr.bf16.mxu1 %v1766_v18 }
0x16dc   :  { %1701 = vmatpush3.bf16.msra.mxu1 %v1767_v20 }
0x16df   :  { %v1949_v60 = vpop.eup %1948 }
0x16e0   :  { %v1385_v1 = vmul.f32 %v1949_v60, %v1311_v63 }
0x1740   :  { %v1388_v40 = vpop.permute.xlu1 %1387 }
0x1741   :  { %v1390_v8 = vmul.f32 %v1949_v60, %v1388_v40 }
0x1743   :  { %1392 = vrot.lane.b32.xlu0 %v1390_v8, %s2050_s3 }
0x1747   :  { %1730 = vrot.lane.b32.xlu0 %v1729_v2, %s2050_s3 }
0x17b5   :  { %v1393_v5 = vpop.permute.xlu0 %1392 }
0x17b6   :  { %v1395_v3 = vadd.f32 %v1393_v5, %v1385_v1 }
0x17b8   :  { %1950 = vtanh.f32 %v1395_v3 }
0x17b9   :  { %v1731_v62 = vpop.permute.xlu0 %1730 }
0x17ba   :  { %v1733_v22 = vunpack.i.h.bf16 %v1731_v62  ;;  %v1732_v52 = vunpack.i.l.bf16 %v1731_v62 }
0x17bc   :  { %v1414_v30 = vsel %vm426_vm8, %v1733_v22, %v2437_v25  ;;  %v1418_v17 = vsel %vm426_vm8, %v1732_v52, %v2531_v55  ;;  %v1664_v25 = vld [vmem:[%s2582_s6] ss:$0 sm:$0xff] }
0x17c5   :  { %v1951_v23 = vpop.eup %1950 }
0x17c6   :  { %1398 = vrot.lane.b32.xlu1 %v1951_v23, %s2043_s27 }
0x17ca   :  { %1735 = vrot.lane.b32.xlu1 %v1734_v24, %s2052_s4 }
0x1838   :  { %v1399_v26 = vpop.permute.xlu1 %1398 }
0x1839   :  { %v1401_v31 = vmul.f32 %v1949_v60, %v1399_v26 }
0x183c   :  { %v1736_v27 = vpop.permute.xlu1 %1735 }
0x183d   :  { %v1738_v28 = vunpack.i.h.bf16 %v1736_v27  ;;  %v1737_v29 = vunpack.i.l.bf16 %v1736_v27 }
0x183f   :  { %v1415_v41 = vsel %vm469_vm9, %v1414_v30, %v1738_v28  ;;  %v1419_v51 = vsel %vm469_vm9, %v1418_v17, %v1737_v29 }
0x1840   :  { %v1420_v50 = vsel %vm1416_vm10, %v1419_v51, %v1401_v31  ;;  %v1417_v57 = vsel %vm1416_vm10, %v1415_v41, %v2484_v34 }
0x1841   :  { %v1422_v46 = vpack.c.bf16 %v1420_v50, %v1420_v50  ;;  %v1421_v33 = vpack.c.bf16 %v1417_v57, %v1417_v57 }
0x1843   :  { %1590 = vmatprep.mubr.bf16.mxu1 %v1422_v46 }
0x1844   :  { %1591 = vmatmul.mubr.bf16.vlgmr.msra.gmra.mxu1 %v1421_v33 }
0x1904   :  { %v1702_v63 = vpop.f32.mrf.mxu1 }
0x1906   :  { %v1703_v19 = vpop.f32.mrf.mxu1 }
0x1907   :  { %v1704_v0 = vadd.f32 %v1703_v19, %v1702_v63 }
0x1908   :  { %v1705_v55 = vpop.f32.mrf.mxu1 }
0x1909   :  { %v1593_v21 = vadd.f32 %v1704_v0, %v1664_v25 }
0x190a   :  { %v1706_v4 = vpop.f32.mrf.mxu1 }
0x190b   :  { %v1599_v7 = vsel %vm1598_vm11, %v1593_v21, -inf }
0x190c   :  { %1600 = vmax.xlane.f32.xlu0 %v1599_v7 }
0x1995   :  { %v1601_v10 = vpop.xlane.xlu0 %1600 }
0x1996   :  { %v1602_v34 = vsub.f32 %v1593_v21, %v1601_v10 }
0x1998   :  { %v1603_v11 = vmul.f32 1.442695, %v1602_v34 }
0x199a   :  { %1952 = vpow2.f32 %v1603_v11 }
0x19a7   :  { %v1953_v12 = vpop.eup %1952 }
0x19a8   :  { %v1605_v6 = vsel %vm1598_vm11, %v1953_v12, 0.0 }
0x19a9   :  { %1606 = vadd.xlane.f32.xlu1 %v1605_v6 }
0x1a32   :  { %v1607_v13 = vpop.xlane.xlu1 %1606 }
0x1a33   :  { %1954 = vrcp.f32 %v1607_v13 }
0x1a40   :  { %v1955_v35 = vpop.eup %1954 }
0x1a41   :  { %v1609_v56 = vmul.f32 %v1955_v35, %v1953_v12 }
0x1a43   :  { %1610 = vst.msk [vmem:[%s2583_s7] sm:$0xff] %vm1598_vm11, %v1609_v56 }
0x1a44   :  { %1615 = vsyncpa [#allocation3], 1 }
0x1a45   :  { %1616 = vsyncpa [#allocation5], 1 }
0x1a46   :  { %1617 = vsyncpa [#allocation8], 1 }

</bundles_post_ra>
